<compile_context>
chip_gen: v7x
topology: tpu7x:2x2x1
jax: 0.10.0
libtpu: 0.0.40
codegen_flags: <defaults>
</compile_context>

<pallas_src>
import functools

import jax
import jax.numpy as jnp
from jax.experimental import pallas as pl
from jax.experimental.pallas import tpu as pltpu

EPS = 1e-5
LANE = 128
SUBLANE = 8


def _round_up(n, m):
    return ((n + m - 1) // m) * m


def _pad2d(a, rows, cols):
    r, c = a.shape
    return jnp.pad(a, ((0, rows - r), (0, cols - c)))


# --------------------- fused path: whole batch resident in VMEM ----------------------
def _fused_kernel(*refs, num_layers, inv_b, n_pad):
    x_ref, gamma_ref, beta_ref = refs[0], refs[1], refs[2]
    wb_refs = refs[3:3 + 2 * num_layers]
    out_ref = refs[3 + 2 * num_layers]

    x = x_ref[...].astype(jnp.float32)                        # (bp, d_in)
    mean = jnp.sum(x, axis=0, keepdims=True) * inv_b          # training-mode batch mean
    xc = x - mean
    # Centered (numerically robust) biased variance; the zero-padded batch rows each
    # contribute (0 - mean)^2 = mean^2, which the n_pad correction removes exactly.
    var = (jnp.sum(xc * xc, axis=0, keepdims=True) - n_pad * (mean * mean)) * inv_b
    var = jnp.maximum(var, 0.0)
    scale = gamma_ref[...] * jax.lax.rsqrt(var + EPS)         # EUP rsqrt, computed once
    h = xc * scale + beta_ref[...]

    for l in range(num_layers):
        w_ref, b_ref = wb_refs[2 * l], wb_refs[2 * l + 1]
        h = jnp.dot(h.astype(w_ref.dtype), w_ref[...],        # bf16 operands, f32 acc
                    preferred_element_type=jnp.float32) + b_ref[...]
        if l + 1 < num_layers:
            h = jnp.maximum(h, 0.0)                           # ReLU
    out_ref[...] = h.astype(out_ref.dtype)                    # lane-dense (bp, dpo) store


# ------------ streaming path, pass 1: full-batch BN sums (reduction grid) ------------
def _bn_stats_kernel(x_ref, sum_ref, sumsq_ref):
    @pl.when(pl.program_id(0) == 0)
    def _():
        sum_ref[...] = jnp.zeros_like(sum_ref)
        sumsq_ref[...] = jnp.zeros_like(sumsq_ref)

    x = x_ref[...].astype(jnp.float32)                        # (tb, d_in)
    sum_ref[...] += jnp.sum(x, axis=0, keepdims=True)
    sumsq_ref[...] += jnp.sum(x * x, axis=0, keepdims=True)


# ----------- streaming path, pass 2: per-tile BN affine + Linear/ReLU stack ----------
def _mlp_tile_kernel(*refs, num_layers):
    x_ref, scale_ref, shift_ref = refs[0], refs[1], refs[2]
    wb_refs = refs[3:3 + 2 * num_layers]
    out_ref = refs[3 + 2 * num_layers]

    h = x_ref[...].astype(jnp.float32) * scale_ref[...] + shift_ref[...]
    for l in range(num_layers):
        w_ref, b_ref = wb_refs[2 * l], wb_refs[2 * l + 1]
        h = jnp.dot(h.astype(w_ref.dtype), w_ref[...],
                    preferred_element_type=jnp.float32) + b_ref[...]
        if l + 1 < num_layers:
            h = jnp.maximum(h, 0.0)
    out_ref[...] = h.astype(out_ref.dtype)                    # lane-dense (tb, dpo) store


def prepare_params(params, *, matmul_dtype=jnp.bfloat16):
    """Pad / pack the parameters ONCE (hoisted out of the per-call forward path).

    Hidden / output widths are zero-padded to multiples of 128 (lane-dense matmul
    outputs and final store); the input feature dim stays at its real size so the x
    DMA only moves real bytes.  Weights are (in, out) and cast to `matmul_dtype`
    (bf16 -> MXU native; accumulation stays f32 inside the kernels).  Zero padding is
    semantics-preserving: padded weight rows multiply exactly-zero activations and
    padded columns + zero bias padding produce exactly-zero activations.
    """
    d_in = int(jnp.asarray(params["gamma"]).shape[-1])
    gamma = jnp.asarray(params["gamma"], jnp.float32).reshape(1, d_in)
    beta = jnp.asarray(params["beta"], jnp.float32).reshape(1, d_in)

    weights, biases = [], []
    prev_pad = d_in                       # layer-0 contraction dim stays unpadded
    for w, b in zip(params["weights"], params["biases"]):
        _, d_out = w.shape
        out_pad = _round_up(d_out, LANE)
        weights.append(
            _pad2d(jnp.asarray(w, jnp.float32), prev_pad, out_pad).astype(matmul_dtype))
        biases.append(_pad2d(jnp.asarray(b, jnp.float32).reshape(1, -1), 1, out_pad))
        prev_pad = out_pad
    return {"gamma": gamma, "beta": beta, "weights": weights, "biases": biases}


def mlp_forward(x, prepared, *, output_size, block_batch=512,
                fuse_vmem_budget=8 * 1024 * 1024):
    """x: (B, d_in) float32.  prepared: output of prepare_params."""
    gamma, beta = prepared["gamma"], prepared["beta"]
    weights, biases = list(prepared["weights"]), list(prepared["biases"])
    num_layers = len(weights)

    B, d_in = x.shape
    assert gamma.shape == (1, d_in)
    padded_widths = [w.shape[1] for w in weights]             # multiples of LANE
    dpo = padded_widths[-1]
    x = x.astype(jnp.float32)

    wb = []
    for w, b in zip(weights, biases):
        wb += [w, b]
    w_bytes = sum(a.size * a.dtype.itemsize for a in wb)

    # ---------------- fused single-kernel path (whole batch in VMEM) ----------------
    bp_fused = _round_up(B, SUBLANE)
    act_bytes = 4 * bp_fused * (d_in + sum(padded_widths))
    if act_bytes + w_bytes <= fuse_vmem_budget:
        xp = _pad2d(x, bp_fused, d_in)                        # batch pad only (zero rows)
        out_p = pl.pallas_call(
            functools.partial(_fused_kernel, num_layers=num_layers,
                              inv_b=1.0 / B, n_pad=float(bp_fused - B)),
            out_shape=jax.ShapeDtypeStruct((bp_fused, dpo), jnp.float32),
        )(xp, gamma, beta, *wb)
        return out_p[:B, :output_size]

    # --------------------------- two-pass streaming path ----------------------------
    # Minimal-padding batch tiling: tb is a multiple of 8, bp - B is small.
    n_tiles = pl.cdiv(B, block_batch)
    tb = _round_up(pl.cdiv(B, n_tiles), SUBLANE)
    bp = n_tiles * tb
    xp = _pad2d(x, bp, d_in)

    # Pass 1: accumulate sum / sum-of-squares over batch tiles (reduction grid axis).
    x_sum, x_sumsq = pl.pallas_call(
        _bn_stats_kernel,
        out_shape=(jax.ShapeDtypeStruct((1, d_in), jnp.float32),
                   jax.ShapeDtypeStruct((1, d_in), jnp.float32)),
        grid=(n_tiles,),
        in_specs=[pl.BlockSpec((tb, d_in), lambda i: (i, 0))],
        out_specs=(pl.BlockSpec((1, d_in), lambda i: (0, 0)),
                   pl.BlockSpec((1, d_in), lambda i: (0, 0))),
        compiler_params=pltpu.CompilerParams(dimension_semantics=("arbitrary",)),
    )(xp)

    # Finalize BN once in a tiny (1, d_in) op -> per-feature affine for pass 2.
    # NOTE: E[x^2] - mean^2 is cancellation-prone when |mean| >> std; acceptable here.
    mean = x_sum * (1.0 / B)
    var = jnp.maximum(x_sumsq * (1.0 / B) - mean * mean, 0.0)
    scale = gamma * jax.lax.rsqrt(var + EPS)
    shift = beta - mean * scale

    const = lambda i: (0, 0)
    in_specs = [pl.BlockSpec((tb, d_in), lambda i: (i, 0)),   # x tile (streamed)
                pl.BlockSpec((1, d_in), const),               # BN scale (resident)
                pl.BlockSpec((1, d_in), const)]               # BN shift (resident)
    for w, b in zip(weights, biases):
        in_specs += [pl.BlockSpec(w.shape, const),            # weights/biases resident
                     pl.BlockSpec(b.shape, const)]

    # Rough VMEM need: 2x double-buffered streamed tiles + resident params +
    # intermediate activations; clamp to v7x physical VMEM.
    est = 4 * 2 * tb * (d_in + dpo) + 2 * w_bytes + 4 * tb * sum(padded_widths)
    vmem_limit = int(min(64 << 20, max(2 * est, 16 << 20)))

    out_p = pl.pallas_call(
        functools.partial(_mlp_tile_kernel, num_layers=num_layers),
        out_shape=jax.ShapeDtypeStruct((bp, dpo), jnp.float32),
        grid=(n_tiles,),
        in_specs=in_specs,
        out_specs=pl.BlockSpec((tb, dpo), lambda i: (i, 0)),
        compiler_params=pltpu.CompilerParams(
            dimension_semantics=("parallel",),                # v7x TCs split batch tiles
            vmem_limit_bytes=vmem_limit),
    )(xp, scale, shift, *wb)

    return out_p[:B, :output_size]


def _init_params(key, input_size, hidden_sizes, output_size):
    """Deterministic synthetic parameters (PyTorch-like uniform init)."""
    if isinstance(hidden_sizes, int):
        hidden_sizes = [hidden_sizes]
    sizes = [input_size] + list(hidden_sizes) + [output_size]
    weights, biases = [], []
    for d_in, d_out in zip(sizes[:-1], sizes[1:]):
        key, kw, kb = jax.random.split(key, 3)
        bound = 1.0 / (d_in ** 0.5)
        # Stored as (in, out); PyTorch stores (out, in) -- transposed here.
        weights.append(jax.random.uniform(kw, (d_in, d_out), jnp.float32, -bound, bound))
        biases.append(jax.random.uniform(kb, (d_out,), jnp.float32, -bound, bound))
    return {"gamma": jnp.ones((input_size,), jnp.float32),   # BatchNorm affine init
            "beta": jnp.zeros((input_size,), jnp.float32),
            "weights": weights, "biases": biases}


def _reference(x, params):
    mean = jnp.mean(x, axis=0, keepdims=True)
    var = jnp.mean((x - mean) ** 2, axis=0, keepdims=True)
    h = (x - mean) / jnp.sqrt(var + EPS) * params["gamma"] + params["beta"]
    n = len(params["weights"])
    for i, (w, b) in enumerate(zip(params["weights"], params["biases"])):
        h = h @ w + b
        if i + 1 < n:
            h = jnp.maximum(h, 0.0)
    return h


if __name__ == "__main__":
    # MLP(input_size=16, hidden_sizes=[32, 32], output_size=8), dropout=0.0.
    input_size, hidden_sizes, output_size = 16, [32, 32], 8

    key = jax.random.PRNGKey(0)
    key, kinit = jax.random.split(key)
    raw = _init_params(kinit, input_size, hidden_sizes, output_size)
    prepared = prepare_params(raw)        # padding/bf16 cast hoisted out of forward

    fwd = jax.jit(mlp_forward,
                  static_argnames=("output_size", "block_batch", "fuse_vmem_budget"))

    # (1) Small batch -> fully fused single pallas_call (BN stats + MLP in one kernel).
    key, kx = jax.random.split(key)
    x_small = jax.random.normal(kx, (300, input_size), jnp.float32)
    out_small = jax.block_until_ready(fwd(x_small, prepared, output_size=output_size))
    ref_small = _reference(x_small, raw)
    assert out_small.shape == (300, output_size)
    assert jnp.allclose(out_small, ref_small, atol=5e-2, rtol=5e-2), \
        "fused path mismatch vs JAX reference"

    # (2) Larger batch forced onto the two-pass streaming path (fuse budget = 0),
    #     exercising the minimal-padding batch tiling (1037 -> 3 tiles of 352 = 1056).
    key, kx = jax.random.split(key)
    x_big = jax.random.normal(kx, (1037, input_size), jnp.float32)
    out_big = jax.block_until_ready(
        fwd(x_big, prepared, output_size=output_size,
            block_batch=512, fuse_vmem_budget=0))
    ref_big = _reference(x_big, raw)
    assert out_big.shape == (1037, output_size)
    assert jnp.allclose(out_big, ref_big, atol=5e-2, rtol=5e-2), \
        "streaming path mismatch vs JAX reference"

    print("KERNEL_OK")
</pallas_src>

<mosaic_0001>
module attributes {stable_mosaic.version = 11 : i64} {
  func.func @_fused_kernel(%arg0: memref<304x16xf32, #tpu.memory_space<vmem>>, %arg1: memref<1x16xf32, #tpu.memory_space<vmem>>, %arg2: memref<1x16xf32, #tpu.memory_space<vmem>>, %arg3: memref<16x128xbf16, #tpu.memory_space<vmem>>, %arg4: memref<1x128xf32, #tpu.memory_space<vmem>>, %arg5: memref<128x128xbf16, #tpu.memory_space<vmem>>, %arg6: memref<1x128xf32, #tpu.memory_space<vmem>>, %arg7: memref<128x128xbf16, #tpu.memory_space<vmem>>, %arg8: memref<1x128xf32, #tpu.memory_space<vmem>>, %arg9: memref<304x128xf32, #tpu.memory_space<vmem>>) attributes {dimension_semantics = [], scalar_prefetch = 0 : i64, scratch_operands = 0 : i64, tpu.core_type = #tpu.core_type<tc>} {
    %c0 = arith.constant 0 : index
    %c0_0 = arith.constant 0 : index
    %0 = vector.load %arg0[%c0, %c0_0] : memref<304x16xf32, #tpu.memory_space<vmem>>, vector<304x16xf32>
    %cst = arith.constant dense<0.000000e+00> : vector<16xf32>
    %1 = vector.multi_reduction <add>, %0, %cst [0] : vector<304x16xf32> to vector<16xf32>
    %2 = vector.shape_cast %1 : vector<16xf32> to vector<1x16xf32>
    %cst_1 = arith.constant 0.00333333341 : f32
    %3 = vector.broadcast %cst_1 : f32 to vector<1x16xf32>
    %4 = arith.mulf %2, %3 : vector<1x16xf32>
    %5 = vector.broadcast %4 : vector<1x16xf32> to vector<304x16xf32>
    %6 = arith.subf %0, %5 : vector<304x16xf32>
    %7 = arith.mulf %6, %6 : vector<304x16xf32>
    %cst_2 = arith.constant dense<0.000000e+00> : vector<16xf32>
    %8 = vector.multi_reduction <add>, %7, %cst_2 [0] : vector<304x16xf32> to vector<16xf32>
    %9 = vector.shape_cast %8 : vector<16xf32> to vector<1x16xf32>
    %10 = arith.mulf %4, %4 : vector<1x16xf32>
    %cst_3 = arith.constant 4.000000e+00 : f32
    %11 = vector.broadcast %cst_3 : f32 to vector<1x16xf32>
    %12 = arith.mulf %11, %10 : vector<1x16xf32>
    %13 = arith.subf %9, %12 : vector<1x16xf32>
    %cst_4 = arith.constant 0.00333333341 : f32
    %14 = vector.broadcast %cst_4 : f32 to vector<1x16xf32>
    %15 = arith.mulf %13, %14 : vector<1x16xf32>
    %cst_5 = arith.constant 0.000000e+00 : f32
    %16 = vector.broadcast %cst_5 : f32 to vector<1x16xf32>
    %17 = arith.maximumf %15, %16 : vector<1x16xf32>
    %c0_6 = arith.constant 0 : index
    %c0_7 = arith.constant 0 : index
    %18 = vector.load %arg1[%c0_6, %c0_7] : memref<1x16xf32, #tpu.memory_space<vmem>>, vector<1x16xf32>
    %cst_8 = arith.constant 9.99999974E-6 : f32
    %19 = vector.broadcast %cst_8 : f32 to vector<1x16xf32>
    %20 = arith.addf %17, %19 : vector<1x16xf32>
    %21 = math.rsqrt %20 : vector<1x16xf32>
    %22 = arith.mulf %18, %21 : vector<1x16xf32>
    %23 = vector.broadcast %22 : vector<1x16xf32> to vector<304x16xf32>
    %24 = arith.mulf %6, %23 : vector<304x16xf32>
    %c0_9 = arith.constant 0 : index
    %c0_10 = arith.constant 0 : index
    %25 = vector.load %arg2[%c0_9, %c0_10] : memref<1x16xf32, #tpu.memory_space<vmem>>, vector<1x16xf32>
    %26 = vector.broadcast %25 : vector<1x16xf32> to vector<304x16xf32>
    %27 = arith.addf %24, %26 : vector<304x16xf32>
    %28 = arith.truncf %27 : vector<304x16xf32> to vector<304x16xbf16>
    %c0_11 = arith.constant 0 : index
    %c0_12 = arith.constant 0 : index
    %29 = vector.load %arg3[%c0_11, %c0_12] : memref<16x128xbf16, #tpu.memory_space<vmem>>, vector<16x128xbf16>
    %cst_13 = arith.constant dense<0.000000e+00> : vector<304x128xf32>
    %30 = tpu.matmul %28, %29, %cst_13 {dimension_numbers = #tpu.dot_dimension_numbers<[1], [0], [0], [1], [0, 0, 1, 1], [], []>} : vector<304x16xbf16>, vector<16x128xbf16>, vector<304x128xf32> -> vector<304x128xf32>
    %c0_14 = arith.constant 0 : index
    %c0_15 = arith.constant 0 : index
    %31 = vector.load %arg4[%c0_14, %c0_15] : memref<1x128xf32, #tpu.memory_space<vmem>>, vector<1x128xf32>
    %32 = vector.broadcast %31 : vector<1x128xf32> to vector<304x128xf32>
    %33 = arith.addf %30, %32 : vector<304x128xf32>
    %cst_16 = arith.constant 0.000000e+00 : f32
    %34 = vector.broadcast %cst_16 : f32 to vector<304x128xf32>
    %35 = arith.maximumf %33, %34 : vector<304x128xf32>
    %36 = arith.truncf %35 : vector<304x128xf32> to vector<304x128xbf16>
    %c0_17 = arith.constant 0 : index
    %c0_18 = arith.constant 0 : index
    %37 = vector.load %arg5[%c0_17, %c0_18] : memref<128x128xbf16, #tpu.memory_space<vmem>>, vector<128x128xbf16>
    %cst_19 = arith.constant dense<0.000000e+00> : vector<304x128xf32>
    %38 = tpu.matmul %36, %37, %cst_19 {dimension_numbers = #tpu.dot_dimension_numbers<[1], [0], [0], [1], [0, 0, 1, 1], [], []>} : vector<304x128xbf16>, vector<128x128xbf16>, vector<304x128xf32> -> vector<304x128xf32>
    %c0_20 = arith.constant 0 : index
    %c0_21 = arith.constant 0 : index
    %39 = vector.load %arg6[%c0_20, %c0_21] : memref<1x128xf32, #tpu.memory_space<vmem>>, vector<1x128xf32>
    %40 = vector.broadcast %39 : vector<1x128xf32> to vector<304x128xf32>
    %41 = arith.addf %38, %40 : vector<304x128xf32>
    %cst_22 = arith.constant 0.000000e+00 : f32
    %42 = vector.broadcast %cst_22 : f32 to vector<304x128xf32>
    %43 = arith.maximumf %41, %42 : vector<304x128xf32>
    %44 = arith.truncf %43 : vector<304x128xf32> to vector<304x128xbf16>
    %c0_23 = arith.constant 0 : index
    %c0_24 = arith.constant 0 : index
    %45 = vector.load %arg7[%c0_23, %c0_24] : memref<128x128xbf16, #tpu.memory_space<vmem>>, vector<128x128xbf16>
    %cst_25 = arith.constant dense<0.000000e+00> : vector<304x128xf32>
    %46 = tpu.matmul %44, %45, %cst_25 {dimension_numbers = #tpu.dot_dimension_numbers<[1], [0], [0], [1], [0, 0, 1, 1], [], []>} : vector<304x128xbf16>, vector<128x128xbf16>, vector<304x128xf32> -> vector<304x128xf32>
    %c0_26 = arith.constant 0 : index
    %c0_27 = arith.constant 0 : index
    %47 = vector.load %arg8[%c0_26, %c0_27] : memref<1x128xf32, #tpu.memory_space<vmem>>, vector<1x128xf32>
    %48 = vector.broadcast %47 : vector<1x128xf32> to vector<304x128xf32>
    %49 = arith.addf %46, %48 : vector<304x128xf32>
    %c0_28 = arith.constant 0 : index
    %c0_29 = arith.constant 0 : index
    %50 = vector.load %arg9[%c0_28, %c0_29] : memref<304x128xf32, #tpu.memory_space<vmem>>, vector<304x128xf32>
    tpu.vector_store %arg9[%c0_28, %c0_29], %49 {strides = array<i32>} : memref<304x128xf32, #tpu.memory_space<vmem>>, vector<304x128xf32>,
    return
  }
}

</mosaic_0001>

<bundles_post_ra>
// kernel: mlp_forward.1
= control target key start
LH: loop header
LB: loop body
LE: loop exit
PB: predicated region body
PF: predicated region fallthrough
CT: control target
= control target key end

     0   :  { %vm71_vm0 = vcmask 130048   ;;  %v1752_v0 = vmov 0.0   ;;  %vm1753_vm1 = vmmov 0   ;;  %s2963_s3 = inlined_call_operand.vmem [shape: bf16[16,128], index: 3, kind: input, shape index: {}]   ;;  %s2964_s0 = inlined_call_operand.vmem [shape: f32[304,16], index: 0, kind: input, shape index: {}]   ;;  %s2965_s5 = inlined_call_operand.vmem [shape: bf16[128,128], index: 5, kind: input, shape index: {}]   ;;  %s2966_s1 = inlined_call_operand.vmem [shape: f32[1,16], index: 1, kind: input, shape index: {}]   ;;  %s2967_s2 = inlined_call_operand.vmem [shape: f32[1,16], index: 2, kind: input, shape index: {}]   ;;  %s2968_s4 = inlined_call_operand.vmem [shape: f32[1,128], index: 4, kind: input, shape index: {}]   ;;  %s2969_s7 = inlined_call_operand.vmem [shape: bf16[128,128], index: 7, kind: input, shape index: {}]   ;;  %s2970_s6 = inlined_call_operand.vmem [shape: f32[1,128], index: 6, kind: input, shape index: {}]   ;;  %s2971_s8 = inlined_call_operand.vmem [shape: f32[1,128], index: 8, kind: input, shape index: {}]   ;;  %s2972_s9 = inlined_call_operand.vmem [shape: f32[304,128], index: 9, kind: output, shape index: {}]  }
   0x1   :  { %1467 = vmatprep.subr.bf16.mxu0 %v1752_v0  ;;  %v1733_v1 = vld [vmem:[%s2963_s3] sm:$0xff]   ;;  %1469 = vmatprep.mubr.msk.bf16.mxu0 %vm1753_vm1, %v1752_v0  ;;  %v1818_v3 = vld [vmem:[%s2964_s0 + $0x8] sm:$0xff]  ;;  %v1823_v4 = vld [vmem:[%s2964_s0 + $0x10] sm:$0xff] }
   0x2   :  { %v1813_v2 = vld [vmem:[%s2964_s0] sm:$0xff]  ;;  %1729 = vmatprep.subr.bf16.mxu1 %v1752_v0  ;;  %1509 = vmatprep.mubr.msk.bf16.mxu1 %vm1753_vm1, %v1752_v0  ;;  %v1831_v5 = vld [vmem:[%s2964_s0 + $0x18] sm:$0xff]  ;;  %v73_v7 = vsel %vm71_vm0, %v1818_v3, 0.0  ;;  %v75_v8 = vsel %vm71_vm0, %v1823_v4, 0.0  ;;  %v1851_v12 = vld [vmem:[%s2964_s0 + $0x28] sm:$0xff] }
   0x3   :  { %1468 = vmatpush3.bf16.msra.mxu0 %v1733_v1  ;;  %v72_v6 = vsel %vm71_vm0, %v1813_v2, 0.0  ;;  %1730 = vmatpush3.bf16.msra.mxu1 %v1733_v1  ;;  %v1842_v9 = vld [vmem:[%s2964_s0 + $0x20] sm:$0xff]  ;;  %v77_v11 = vsel %vm71_vm0, %v1831_v5, 0.0  ;;  %v1858_v15 = vld [vmem:[%s2964_s0 + $0x30] sm:$0xff]  ;;  %v81_v17 = vsel %vm71_vm0, %v1851_v12, 0.0  ;;  %v1865_v18 = vld [vmem:[%s2964_s0 + $0x38] sm:$0xff] }
   0x4   :  { %v74_v10 = vadd.f32 %v73_v7, %v72_v6  ;;  %1545 = vmatprep.subr.bf16.mxu1 %v1752_v0  ;;  %1637 = vmatprep.subr.bf16.mxu0 %v1752_v0  ;;  %v79_v14 = vsel %vm71_vm0, %v1842_v9, 0.0  ;;  %v83_v20 = vsel %vm71_vm0, %v1858_v15, 0.0  ;;  %v1872_v21 = vld [vmem:[%s2964_s0 + $0x40] sm:$0xff]  ;;  %v85_v23 = vsel %vm71_vm0, %v1865_v18, 0.0  ;;  %v1879_v24 = vld [vmem:[%s2964_s0 + $0x48] sm:$0xff]  ;;  %v1886_v27 = vld [vmem:[%s2964_s0 + $0x50] sm:$0xff] }
   0x5   :  { %v87_v26 = vsel %vm71_vm0, %v1872_v21, 0.0  ;;  %v89_v29 = vsel %vm71_vm0, %v1879_v24, 0.0  ;;  %v1893_v30 = vld [vmem:[%s2964_s0 + $0x58] sm:$0xff]  ;;  %v91_v32 = vsel %vm71_vm0, %v1886_v27, 0.0  ;;  %v1900_v33 = vld [vmem:[%s2964_s0 + $0x60] sm:$0xff]  ;;  %v1907_v36 = vld [vmem:[%s2964_s0 + $0x68] sm:$0xff] }
   0x6   :  { %v76_v13 = vadd.f32 %v75_v8, %v74_v10  ;;  %v93_v35 = vsel %vm71_vm0, %v1893_v30, 0.0  ;;  %v95_v38 = vsel %vm71_vm0, %v1900_v33, 0.0  ;;  %v1914_v39 = vld [vmem:[%s2964_s0 + $0x70] sm:$0xff]  ;;  %v97_v41 = vsel %vm71_vm0, %v1907_v36, 0.0  ;;  %v1921_v42 = vld [vmem:[%s2964_s0 + $0x78] sm:$0xff]  ;;  %v1928_v45 = vld [vmem:[%s2964_s0 + $0x80] sm:$0xff] }
   0x7   :  { %v99_v44 = vsel %vm71_vm0, %v1914_v39, 0.0  ;;  %v101_v47 = vsel %vm71_vm0, %v1921_v42, 0.0  ;;  %v1935_v48 = vld [vmem:[%s2964_s0 + $0x88] sm:$0xff]  ;;  %v103_v50 = vsel %vm71_vm0, %v1928_v45, 0.0  ;;  %v1942_v51 = vld [vmem:[%s2964_s0 + $0x90] sm:$0xff]  ;;  %v1949_v54 = vld [vmem:[%s2964_s0 + $0x98] sm:$0xff] }
   0x8   :  { %v78_v16 = vadd.f32 %v77_v11, %v76_v13  ;;  %v105_v53 = vsel %vm71_vm0, %v1935_v48, 0.0  ;;  %v107_v56 = vsel %vm71_vm0, %v1942_v51, 0.0  ;;  %v1956_v57 = vld [vmem:[%s2964_s0 + $0xa0] sm:$0xff]  ;;  %v109_v59 = vsel %vm71_vm0, %v1949_v54, 0.0  ;;  %v1963_v60 = vld [vmem:[%s2964_s0 + $0xa8] sm:$0xff]  ;;  %v1970_v63 = vld [vmem:[%s2964_s0 + $0xb0] sm:$0xff] }
   0x9   :  { %v111_v62 = vsel %vm71_vm0, %v1956_v57, 0.0  ;;  %v113_v6 = vsel %vm71_vm0, %v1963_v60, 0.0  ;;  %v1977_v7 = vld [vmem:[%s2964_s0 + $0xb8] sm:$0xff]  ;;  %v115_v10 = vsel %vm71_vm0, %v1970_v63, 0.0  ;;  %v1984_v11 = vld [vmem:[%s2964_s0 + $0xc0] sm:$0xff] }
   0xa   :  { %v80_v19 = vadd.f32 %v79_v14, %v78_v16  ;;  %v117_v14 = vsel %vm71_vm0, %v1977_v7, 0.0  ;;  %v1991_v16 = vld [vmem:[%s2964_s0 + $0xc8] sm:$0xff] }
   0xc   :  { %v82_v22 = vadd.f32 %v81_v17, %v80_v19  ;;  %v119_v19 = vsel %vm71_vm0, %v1984_v11, 0.0 }
   0xe   :  { %v84_v25 = vadd.f32 %v83_v20, %v82_v22  ;;  %v1998_v20 = vld [vmem:[%s2964_s0 + $0xd0] sm:$0xff] }
  0x10   :  { %v86_v28 = vadd.f32 %v85_v23, %v84_v25  ;;  %v121_v23 = vsel %vm71_vm0, %v1991_v16, 0.0  ;;  %v2005_v25 = vld [vmem:[%s2964_s0 + $0xd8] sm:$0xff] }
  0x12   :  { %v88_v31 = vadd.f32 %v87_v26, %v86_v28  ;;  %v123_v28 = vsel %vm71_vm0, %v1998_v20, 0.0 }
  0x14   :  { %v90_v34 = vadd.f32 %v89_v29, %v88_v31  ;;  %v2012_v29 = vld [vmem:[%s2964_s0 + $0xe0] sm:$0xff] }
  0x16   :  { %v92_v37 = vadd.f32 %v91_v32, %v90_v34  ;;  %v125_v32 = vsel %vm71_vm0, %v2005_v25, 0.0  ;;  %v2019_v34 = vld [vmem:[%s2964_s0 + $0xe8] sm:$0xff] }
  0x18   :  { %v94_v40 = vadd.f32 %v93_v35, %v92_v37  ;;  %v127_v37 = vsel %vm71_vm0, %v2012_v29, 0.0 }
  0x1a   :  { %v96_v43 = vadd.f32 %v95_v38, %v94_v40  ;;  %v2026_v38 = vld [vmem:[%s2964_s0 + $0xf0] sm:$0xff] }
  0x1c   :  { %v98_v46 = vadd.f32 %v97_v41, %v96_v43  ;;  %v129_v41 = vsel %vm71_vm0, %v2019_v34, 0.0  ;;  %v2033_v43 = vld [vmem:[%s2964_s0 + $0xf8] sm:$0xff] }
  0x1e   :  { %v100_v49 = vadd.f32 %v99_v44, %v98_v46  ;;  %v131_v46 = vsel %vm71_vm0, %v2026_v38, 0.0 }
  0x20   :  { %v102_v52 = vadd.f32 %v101_v47, %v100_v49  ;;  %v2040_v47 = vld [vmem:[%s2964_s0 + $0x100] sm:$0xff] }
  0x22   :  { %v104_v55 = vadd.f32 %v103_v50, %v102_v52  ;;  %v133_v50 = vsel %vm71_vm0, %v2033_v43, 0.0  ;;  %v2047_v52 = vld [vmem:[%s2964_s0 + $0x108] sm:$0xff] }
  0x24   :  { %v106_v58 = vadd.f32 %v105_v53, %v104_v55  ;;  %v135_v55 = vsel %vm71_vm0, %v2040_v47, 0.0 }
  0x26   :  { %v108_v61 = vadd.f32 %v107_v56, %v106_v58  ;;  %v2054_v56 = vld [vmem:[%s2964_s0 + $0x110] sm:$0xff] }
  0x28   :  { %v110_v1 = vadd.f32 %v109_v59, %v108_v61  ;;  %v137_v59 = vsel %vm71_vm0, %v2047_v52, 0.0  ;;  %v2061_v61 = vld [vmem:[%s2964_s0 + $0x118] sm:$0xff] }
  0x2a   :  { %v112_v8 = vadd.f32 %v111_v62, %v110_v1  ;;  %v139_v1 = vsel %vm71_vm0, %v2054_v56, 0.0 }
  0x2c   :  { %v114_v13 = vadd.f32 %v113_v6, %v112_v8  ;;  %v2068_v6 = vld [vmem:[%s2964_s0 + $0x120] sm:$0xff] }
  0x2e   :  { %v116_v17 = vadd.f32 %v115_v10, %v114_v13  ;;  %v141_v10 = vsel %vm71_vm0, %v2061_v61, 0.0  ;;  %v2075_v13 = vld [vmem:[%s2964_s0 + $0x128] sm:$0xff] }
  0x30   :  { %v118_v22 = vadd.f32 %v117_v14, %v116_v17  ;;  %v143_v17 = vsel %vm71_vm0, %v2068_v6, 0.0 }
  0x32   :  { %v120_v26 = vadd.f32 %v119_v19, %v118_v22  ;;  %v145_v22 = vsel %vm71_vm0, %v2075_v13, 0.0 }
  0x34   :  { %v122_v31 = vadd.f32 %v121_v23, %v120_v26 }
  0x36   :  { %v124_v35 = vadd.f32 %v123_v28, %v122_v31 }
  0x38   :  { %v126_v40 = vadd.f32 %v125_v32, %v124_v35 }
  0x3a   :  { %v128_v44 = vadd.f32 %v127_v37, %v126_v40 }
  0x3c   :  { %v130_v49 = vadd.f32 %v129_v41, %v128_v44 }
  0x3e   :  { %v132_v53 = vadd.f32 %v131_v46, %v130_v49 }
  0x40   :  { %v134_v58 = vadd.f32 %v133_v50, %v132_v53 }
  0x42   :  { %v136_v62 = vadd.f32 %v135_v55, %v134_v58 }
  0x44   :  { %v138_v8 = vadd.f32 %v137_v59, %v136_v62 }
  0x46   :  { %v140_v14 = vadd.f32 %v139_v1, %v138_v8 }
  0x48   :  { %v142_v19 = vadd.f32 %v141_v10, %v140_v14 }
  0x4a   :  { %v144_v23 = vadd.f32 %v143_v17, %v142_v19 }
  0x4c   :  { %v146_v26 = vadd.f32 %v145_v22, %v144_v23 }
  0x4e   :  { %v147_v28 = vrot.slane %v146_v26, 4 }
  0x50   :  { %v148_v31 = vadd.f32 %v147_v28, %v146_v26 }
  0x52   :  { %v149_v32 = vrot.slane %v148_v31, 2 }
  0x54   :  { %v150_v35 = vadd.f32 %v149_v32, %v148_v31 }
  0x56   :  { %v151_v37 = vrot.slane %v150_v35, 1 }
  0x58   :  { %v152_v40 = vadd.f32 %v151_v37, %v150_v35 }
  0x5a   :  { %v2081_v41 = vmul.f32 0.0033333334, %v152_v40 }
  0x5c   :  { %v2085_v44 = vsub.f32 %v1813_v2, %v2081_v41  ;;  %v2089_v46 = vsub.f32 %v1818_v3, %v2081_v41  ;;  %v2093_v49 = vsub.f32 %v1823_v4, %v2081_v41  ;;  %v2097_v50 = vsub.f32 %v1831_v5, %v2081_v41 }
  0x5d   :  { %v2101_v53 = vsub.f32 %v1842_v9, %v2081_v41  ;;  %v2111_v4 = vsub.f32 %v1851_v12, %v2081_v41  ;;  %v2117_v9 = vsub.f32 %v1858_v15, %v2081_v41  ;;  %v2126_v12 = vsub.f32 %v1865_v18, %v2081_v41 }
  0x5e   :  { %v192_v2 = vmul.f32 %v2085_v44, %v2085_v44  ;;  %v193_v55 = vmul.f32 %v2089_v46, %v2089_v46  ;;  %v194_v3 = vmul.f32 %v2093_v49, %v2093_v49  ;;  %v195_v5 = vmul.f32 %v2097_v50, %v2097_v50 }
  0x5f   :  { %v196_v58 = vmul.f32 %v2101_v53, %v2101_v53  ;;  %v197_v10 = vmul.f32 %v2111_v4, %v2111_v4  ;;  %v2133_v17 = vsub.f32 %v1872_v21, %v2081_v41  ;;  %v198_v19 = vmul.f32 %v2117_v9, %v2117_v9 }
  0x60   :  { %v230_v59 = vsel %vm71_vm0, %v192_v2, 0.0  ;;  %v231_v62 = vsel %vm71_vm0, %v193_v55, 0.0  ;;  %v233_v1 = vsel %vm71_vm0, %v194_v3, 0.0  ;;  %v235_v15 = vsel %vm71_vm0, %v195_v5, 0.0 }
  0x61   :  { %v232_v8 = vadd.f32 %v231_v62, %v230_v59  ;;  %v237_v22 = vsel %vm71_vm0, %v196_v58, 0.0  ;;  %v2140_v18 = vsub.f32 %v1879_v24, %v2081_v41  ;;  %v199_v26 = vmul.f32 %v2126_v12, %v2126_v12 }
  0x62   :  { %v239_v28 = vsel %vm71_vm0, %v197_v10, 0.0  ;;  %v2147_v21 = vsub.f32 %v1886_v27, %v2081_v41  ;;  %v200_v32 = vmul.f32 %v2133_v17, %v2133_v17  ;;  %v241_v35 = vsel %vm71_vm0, %v198_v19, 0.0 }
  0x63   :  { %v234_v14 = vadd.f32 %v233_v1, %v232_v8  ;;  %v2154_v24 = vsub.f32 %v1893_v30, %v2081_v41  ;;  %v201_v40 = vmul.f32 %v2140_v18, %v2140_v18  ;;  %v243_v2 = vsel %vm71_vm0, %v199_v26, 0.0 }
  0x64   :  { %v2161_v27 = vsub.f32 %v1900_v33, %v2081_v41  ;;  %v202_v3 = vmul.f32 %v2147_v21, %v2147_v21  ;;  %v245_v5 = vsel %vm71_vm0, %v200_v32, 0.0  ;;  %v2168_v30 = vsub.f32 %v1907_v36, %v2081_v41 }
  0x65   :  { %v236_v23 = vadd.f32 %v235_v15, %v234_v14  ;;  %v203_v59 = vmul.f32 %v2154_v24, %v2154_v24  ;;  %v247_v62 = vsel %vm71_vm0, %v201_v40, 0.0  ;;  %v2175_v33 = vsub.f32 %v1914_v39, %v2081_v41 }
  0x66   :  { %v204_v8 = vmul.f32 %v2161_v27, %v2161_v27  ;;  %v249_v10 = vsel %vm71_vm0, %v202_v3, 0.0  ;;  %v2182_v36 = vsub.f32 %v1921_v42, %v2081_v41  ;;  %v205_v14 = vmul.f32 %v2168_v30, %v2168_v30 }
  0x67   :  { %v238_v31 = vadd.f32 %v237_v22, %v236_v23  ;;  %v251_v19 = vsel %vm71_vm0, %v203_v59, 0.0  ;;  %v2189_v39 = vsub.f32 %v1928_v45, %v2081_v41  ;;  %v206_v23 = vmul.f32 %v2175_v33, %v2175_v33 }
  0x68   :  { %v253_v26 = vsel %vm71_vm0, %v204_v8, 0.0  ;;  %v2196_v42 = vsub.f32 %v1935_v48, %v2081_v41  ;;  %v255_v32 = vsel %vm71_vm0, %v205_v14, 0.0  ;;  %v2203_v45 = vsub.f32 %v1942_v51, %v2081_v41 }
  0x69   :  { %v240_v37 = vadd.f32 %v239_v28, %v238_v31  ;;  %v207_v31 = vmul.f32 %v2182_v36, %v2182_v36  ;;  %v257_v40 = vsel %vm71_vm0, %v206_v23, 0.0  ;;  %v2210_v48 = vsub.f32 %v1949_v54, %v2081_v41 }
  0x6a   :  { %v2217_v51 = vsub.f32 %v1956_v57, %v2081_v41  ;;  %v2224_v54 = vsub.f32 %v1963_v60, %v2081_v41  ;;  %v2231_v57 = vsub.f32 %v1970_v63, %v2081_v41  ;;  %v2238_v60 = vsub.f32 %v1977_v7, %v2081_v41 }
  0x6b   :  { %v242_v55 = vadd.f32 %v241_v35, %v240_v37  ;;  %v208_v37 = vmul.f32 %v2189_v39, %v2189_v39  ;;  %v259_v3 = vsel %vm71_vm0, %v207_v31, 0.0  ;;  %v2245_v63 = vsub.f32 %v1984_v11, %v2081_v41 }
  0x6c   :  { %v2252_v7 = vsub.f32 %v1991_v16, %v2081_v41  ;;  %v2259_v11 = vsub.f32 %v1998_v20, %v2081_v41  ;;  %v2266_v16 = vsub.f32 %v2005_v25, %v2081_v41  ;;  %v2273_v20 = vsub.f32 %v2012_v29, %v2081_v41 }
  0x6d   :  { %v244_v58 = vadd.f32 %v243_v2, %v242_v55  ;;  %v209_v55 = vmul.f32 %v2196_v42, %v2196_v42  ;;  %v261_v59 = vsel %vm71_vm0, %v208_v37, 0.0  ;;  %v2280_v25 = vsub.f32 %v2019_v34, %v2081_v41 }
  0x6e   :  { %v2287_v29 = vsub.f32 %v2026_v38, %v2081_v41  ;;  %v2294_v34 = vsub.f32 %v2033_v43, %v2081_v41  ;;  %v2301_v38 = vsub.f32 %v2040_v47, %v2081_v41  ;;  %v2308_v43 = vsub.f32 %v2047_v52, %v2081_v41 }
  0x6f   :  { %v246_v1 = vadd.f32 %v245_v5, %v244_v58  ;;  %v210_v58 = vmul.f32 %v2203_v45, %v2203_v45  ;;  %v263_v8 = vsel %vm71_vm0, %v209_v55, 0.0  ;;  %v2315_v47 = vsub.f32 %v2054_v56, %v2081_v41 }
  0x70   :  { %v2322_v52 = vsub.f32 %v2061_v61, %v2081_v41  ;;  %v2329_v56 = vsub.f32 %v2068_v6, %v2081_v41  ;;  %v2336_v61 = vsub.f32 %v2075_v13, %v2081_v41 }
  0x71   :  { %v248_v15 = vadd.f32 %v247_v62, %v246_v1  ;;  %v211_v1 = vmul.f32 %v2210_v48, %v2210_v48  ;;  %v265_v14 = vsel %vm71_vm0, %v210_v58, 0.0 }
  0x72   :  { %v228_v6 = vmul.f32 %v2329_v56, %v2329_v56 }
  0x73   :  { %v250_v22 = vadd.f32 %v249_v10, %v248_v15  ;;  %v212_v15 = vmul.f32 %v2217_v51, %v2217_v51  ;;  %v267_v23 = vsel %vm71_vm0, %v211_v1, 0.0 }
  0x74   :  { %v301_v13 = vsel %vm71_vm0, %v228_v6, 0.0 }
  0x75   :  { %v252_v28 = vadd.f32 %v251_v19, %v250_v22  ;;  %v213_v22 = vmul.f32 %v2224_v54, %v2224_v54  ;;  %v269_v31 = vsel %vm71_vm0, %v212_v15, 0.0 }
  0x77   :  { %v254_v35 = vadd.f32 %v253_v26, %v252_v28  ;;  %v214_v28 = vmul.f32 %v2231_v57, %v2231_v57  ;;  %v271_v37 = vsel %vm71_vm0, %v213_v22, 0.0 }
  0x79   :  { %v256_v2 = vadd.f32 %v255_v32, %v254_v35  ;;  %v215_v35 = vmul.f32 %v2238_v60, %v2238_v60  ;;  %v273_v55 = vsel %vm71_vm0, %v214_v28, 0.0 }
  0x7b   :  { %v258_v5 = vadd.f32 %v257_v40, %v256_v2  ;;  %v216_v2 = vmul.f32 %v2245_v63, %v2245_v63  ;;  %v275_v58 = vsel %vm71_vm0, %v215_v35, 0.0 }
  0x7d   :  { %v260_v62 = vadd.f32 %v259_v3, %v258_v5  ;;  %v217_v5 = vmul.f32 %v2252_v7, %v2252_v7  ;;  %v277_v1 = vsel %vm71_vm0, %v216_v2, 0.0 }
  0x7f   :  { %v262_v10 = vadd.f32 %v261_v59, %v260_v62  ;;  %v218_v62 = vmul.f32 %v2259_v11, %v2259_v11  ;;  %v279_v15 = vsel %vm71_vm0, %v217_v5, 0.0 }
  0x81   :  { %v264_v19 = vadd.f32 %v263_v8, %v262_v10  ;;  %v219_v10 = vmul.f32 %v2266_v16, %v2266_v16  ;;  %v281_v22 = vsel %vm71_vm0, %v218_v62, 0.0 }
  0x83   :  { %v266_v26 = vadd.f32 %v265_v14, %v264_v19  ;;  %v220_v19 = vmul.f32 %v2273_v20, %v2273_v20  ;;  %v283_v28 = vsel %vm71_vm0, %v219_v10, 0.0 }
  0x85   :  { %v268_v32 = vadd.f32 %v267_v23, %v266_v26  ;;  %v221_v26 = vmul.f32 %v2280_v25, %v2280_v25  ;;  %v285_v35 = vsel %vm71_vm0, %v220_v19, 0.0 }
  0x87   :  { %v270_v40 = vadd.f32 %v269_v31, %v268_v32  ;;  %v222_v32 = vmul.f32 %v2287_v29, %v2287_v29  ;;  %v287_v2 = vsel %vm71_vm0, %v221_v26, 0.0 }
  0x89   :  { %v272_v3 = vadd.f32 %v271_v37, %v270_v40  ;;  %v223_v40 = vmul.f32 %v2294_v34, %v2294_v34  ;;  %v289_v5 = vsel %vm71_vm0, %v222_v32, 0.0 }
  0x8b   :  { %v274_v59 = vadd.f32 %v273_v55, %v272_v3  ;;  %v224_v3 = vmul.f32 %v2301_v38, %v2301_v38  ;;  %v291_v62 = vsel %vm71_vm0, %v223_v40, 0.0 }
  0x8d   :  { %v276_v8 = vadd.f32 %v275_v58, %v274_v59  ;;  %v225_v59 = vmul.f32 %v2308_v43, %v2308_v43  ;;  %v293_v10 = vsel %vm71_vm0, %v224_v3, 0.0 }
  0x8f   :  { %v278_v14 = vadd.f32 %v277_v1, %v276_v8  ;;  %v226_v8 = vmul.f32 %v2315_v47, %v2315_v47  ;;  %v295_v19 = vsel %vm71_vm0, %v225_v59, 0.0 }
  0x91   :  { %v280_v23 = vadd.f32 %v279_v15, %v278_v14  ;;  %v227_v14 = vmul.f32 %v2322_v52, %v2322_v52 }
  0x93   :  { %v282_v31 = vadd.f32 %v281_v22, %v280_v23  ;;  %v297_v23 = vsel %vm71_vm0, %v226_v8, 0.0 }
  0x95   :  { %v284_v37 = vadd.f32 %v283_v28, %v282_v31  ;;  %v229_v28 = vmul.f32 %v2336_v61, %v2336_v61  ;;  %v299_v31 = vsel %vm71_vm0, %v227_v14, 0.0 }
  0x97   :  { %v286_v55 = vadd.f32 %v285_v35, %v284_v37  ;;  %v303_v37 = vsel %vm71_vm0, %v229_v28, 0.0 }
  0x99   :  { %v288_v58 = vadd.f32 %v287_v2, %v286_v55 }
  0x9b   :  { %v290_v1 = vadd.f32 %v289_v5, %v288_v58  ;;  %v311_v58 = vmul.f32 %v2081_v41, %v2081_v41  ;;  %v2359_v41 = vld [vmem:[%s2967_s2] ss:$0 sm:$0xff] }
  0x9d   :  { %v292_v15 = vadd.f32 %v291_v62, %v290_v1  ;;  %v312_v1 = vmul.f32 4.0, %v311_v58 }
  0x9f   :  { %v294_v22 = vadd.f32 %v293_v10, %v292_v15 }
  0xa1   :  { %v296_v26 = vadd.f32 %v295_v19, %v294_v22  ;;  %v321_v22 = vlaneseq }
  0xa3   :  { %v298_v32 = vadd.f32 %v297_v23, %v296_v26  ;;  %v322_v6 = vshrl.u32 %v321_v22, 7  ;;  %v316_v23 = vld [vmem:[%s2966_s1] sm:$0x1] }
  0xa5   :  { %v300_v35 = vadd.f32 %v299_v31, %v298_v32  ;;  %v323_v26 = vsub.s32 0, %v322_v6  ;;  %v1734_v6 = vld [vmem:[%s2965_s5] sm:$0xff]  }
  0xa7   :  { %v302_v40 = vadd.f32 %v301_v13, %v300_v35 }
  0xa9   :  { %v304_v2 = vadd.f32 %v303_v37, %v302_v40 }
  0xab   :  { %v305_v55 = vrot.slane %v304_v2, 4 }
  0xad   :  { %v306_v3 = vadd.f32 %v305_v55, %v304_v2 }
  0xaf   :  { %v307_v5 = vrot.slane %v306_v3, 2 }
  0xb1   :  { %v308_v59 = vadd.f32 %v307_v5, %v306_v3 }
  0xb3   :  { %v309_v62 = vrot.slane %v308_v59, 1 }
  0xb5   :  { %v310_v8 = vadd.f32 %v309_v62, %v308_v59 }
  0xb7   :  { %v313_v10 = vsub.f32 %v310_v8, %v312_v1 }
  0xb9   :  { %v314_v15 = vmul.f32 0.0033333334, %v313_v10 }
  0xbb   :  { %v315_v14 = vmax.f32 %v314_v15, 0.0 }
  0xbd   :  { %v317_v19 = vadd.f32 1e-05, %v315_v14 }
  0xbf   :  { %1750 = vrsqrt.f32 %v317_v19 }
  0xc9   :  { %v1751_v28 = vpop.eup %1750 }
  0xca   :  { %v319_v31 = vmul.f32 %v1751_v28, %v316_v23 }
  0xcc   :  { %v2354_v32 = vrot.slane %v319_v31, %v323_v26 }
  0xce   :  { %v326_v13 = vmul.f32 %v2354_v32, %v2085_v44  ;;  %v327_v35 = vmul.f32 %v2354_v32, %v2089_v46  ;;  %v328_v2 = vmul.f32 %v2354_v32, %v2093_v49  ;;  %v329_v55 = vmul.f32 %v2354_v32, %v2097_v50 }
  0xcf   :  { %v342_v46 = vmul.f32 %v2354_v32, %v2189_v39  ;;  %v330_v58 = vmul.f32 %v2354_v32, %v2101_v53  ;;  %v331_v49 = vmul.f32 %v2354_v32, %v2111_v4  ;;  %v343_v50 = vmul.f32 %v2354_v32, %v2196_v42 }
  0xd0   :  { %v371_v37 = vadd.f32 %v2359_v41, %v326_v13  ;;  %v372_v40 = vadd.f32 %v2359_v41, %v327_v35  ;;  %v373_v5 = vadd.f32 %v2359_v41, %v328_v2  ;;  %v374_v44 = vadd.f32 %v2359_v41, %v329_v55  ;;  %v1735_v13 = vld [vmem:[%s2965_s5 + $0x8] sm:$0xff]  }
  0xd1   :  { %v2385_v62 = vadd.f32 %v2359_v41, %v342_v46  ;;  %v344_v1 = vmul.f32 %v2354_v32, %v2203_v45  ;;  %v345_v8 = vmul.f32 %v2354_v32, %v2210_v48  ;;  %v2392_v39 = vadd.f32 %v2359_v41, %v343_v50 }
  0xd2   :  { %v409_v3 = vpack.c.bf16 %v372_v40, %v371_v37  ;;  %v410_v59 = vpack.c.bf16 %v374_v44, %v373_v5  ;;  %v346_v53 = vmul.f32 %v2354_v32, %v2217_v51  ;;  %v347_v4 = vmul.f32 %v2354_v32, %v2224_v54 }
  0xd3   :  { %v2399_v42 = vadd.f32 %v2359_v41, %v344_v1  ;;  %v2402_v10 = vadd.f32 %v2359_v41, %v345_v8  ;;  %v348_v45 = vmul.f32 %v2354_v32, %v2231_v57  ;;  %v417_v48 = vpack.c.bf16 %v2392_v39, %v2385_v62  ;;  %v1737_v1 = vld [vmem:[%s2965_s5 + $0x18] sm:$0xff]  }
  0xd4   :  { %1470 = vmatmul.mubr.msk.bf16.vlgmr.msra.gmra.mrb[0].mxu0 %vm71_vm0, %v409_v3  ;;  %v391_v15 = vadd.f32 %v2359_v41, %v346_v53  ;;  %v392_v14 = vadd.f32 %v2359_v41, %v347_v4  ;;  %v349_v51 = vmul.f32 %v2354_v32, %v2238_v60  ;;  %v375_v54 = vadd.f32 %v2359_v41, %v330_v58 }
  0xd5   :  { %1473 = vmatprep.mubr.msk.bf16.mxu0 %vm1753_vm1, %v1752_v0  ;;  %v376_v19 = vadd.f32 %v2359_v41, %v331_v49  ;;  %v418_v22 = vpack.c.bf16 %v2402_v10, %v2399_v42  ;;  %v393_v60 = vadd.f32 %v2359_v41, %v348_v45  ;;  %v332_v28 = vmul.f32 %v2354_v32, %v2117_v9  ;;  %v1738_v45 = vld [vmem:[%s2965_s5 + $0x20] sm:$0xff]  }
  0xd6   :  { %v419_v57 = vpack.c.bf16 %v392_v14, %v391_v15  ;;  %v394_v23 = vadd.f32 %v2359_v41, %v349_v51  ;;  %v333_v31 = vmul.f32 %v2354_v32, %v2126_v12  ;;  %v350_v35 = vmul.f32 %v2354_v32, %v2245_v63 }
  0xd7   :  { %v411_v26 = vpack.c.bf16 %v376_v19, %v375_v54  ;;  %v360_v37 = vmul.f32 %v2354_v32, %v2315_v47  ;;  %v361_v9 = vmul.f32 %v2354_v32, %v2322_v52  ;;  %v351_v40 = vmul.f32 %v2354_v32, %v2252_v7  ;;  %v1739_v54 = vld [vmem:[%s2965_s5 + $0x28] sm:$0xff]  }
  0xd8   :  { %1510 = vmatmul.mubr.msk.bf16.vlgmr.msra.gmra.mrb[0].mxu1 %vm71_vm0, %v419_v57  ;;  %v420_v12 = vpack.c.bf16 %v394_v23, %v393_v60  ;;  %v362_v2 = vmul.f32 %v2354_v32, %v2329_v56  ;;  %v363_v55 = vmul.f32 %v2354_v32, %v2336_v61  ;;  %v377_v63 = vadd.f32 %v2359_v41, %v332_v28  ;;  %v1736_v61 = vld [vmem:[%s2965_s5 + $0x10] sm:$0xff]  }
  0xd9   :  { %1513 = vmatprep.mubr.msk.bf16.mxu1 %vm1753_vm1, %v1752_v0  ;;  %1546 = vmatpush3.bf16.msra.mxu1 %v1734_v6  ;;  %v378_v47 = vadd.f32 %v2359_v41, %v333_v31  ;;  %v2451_v52 = vadd.f32 %v2359_v41, %v360_v37  ;;  %v2454_v3 = vadd.f32 %v2359_v41, %v361_v9  ;;  %v1740_v60 = vld [vmem:[%s2965_s5 + $0x30] sm:$0xff]  }
  0xda   :  { %1547 = vmatprep.subr.bf16.mxu1 %v1752_v0  ;;  %v2459_v7 = vadd.f32 %v2359_v41, %v362_v2  ;;  %v2462_v56 = vadd.f32 %v2359_v41, %v363_v55  ;;  %v395_v44 = vadd.f32 %v2359_v41, %v350_v35  ;;  %v396_v46 = vadd.f32 %v2359_v41, %v351_v40 }
  0xdb   :  { %v426_v5 = vpack.c.bf16 %v2454_v3, %v2451_v52  ;;  %v412_v49 = vpack.c.bf16 %v378_v47, %v377_v63  ;;  %v334_v50 = vmul.f32 %v2354_v32, %v2133_v17  ;;  %v352_v53 = vmul.f32 %v2354_v32, %v2259_v11 }
  0xdc   :  { %1474 = vmatmul.mubr.msk.bf16.gmra.mrb[4].mxu0 %vm71_vm0, %v410_v59  ;;  %v427_v58 = vpack.c.bf16 %v2462_v56, %v2459_v7  ;;  %v335_v59 = vmul.f32 %v2354_v32, %v2140_v18  ;;  %v421_v8 = vpack.c.bf16 %v396_v46, %v395_v44  ;;  %v353_v17 = vmul.f32 %v2354_v32, %v2266_v16 }
  0xdd   :  { %1477 = vmatprep.mubr.msk.bf16.mxu0 %vm1753_vm1, %v1752_v0  ;;  %1548 = vmatpush3.bf16.msra.mxu1 %v1735_v13  ;;  %v379_v18 = vadd.f32 %v2359_v41, %v334_v50  ;;  %v397_v11 = vadd.f32 %v2359_v41, %v352_v53  ;;  %v336_v14 = vmul.f32 %v2354_v32, %v2147_v21 }
  0xde   :  { %1549 = vmatprep.subr.bf16.mxu1 %v1752_v0  ;;  %v380_v4 = vadd.f32 %v2359_v41, %v335_v59  ;;  %v398_v16 = vadd.f32 %v2359_v41, %v353_v17  ;;  %v337_v51 = vmul.f32 %v2354_v32, %v2154_v24  ;;  %v354_v57 = vmul.f32 %v2354_v32, %v2273_v20 }
  0xdf   :  { %v355_v21 = vmul.f32 %v2354_v32, %v2280_v25  ;;  %v381_v24 = vadd.f32 %v2359_v41, %v336_v14  ;;  %v339_v28 = vmul.f32 %v2354_v32, %v2168_v30  ;;  %v356_v13 = vmul.f32 %v2354_v32, %v2287_v29 }
  0xe0   :  { %1514 = vmatmul.mubr.msk.bf16.gmra.mrb[4].mxu1 %vm71_vm0, %v420_v12  ;;  %v413_v15 = vpack.c.bf16 %v380_v4, %v379_v18  ;;  %v422_v19 = vpack.c.bf16 %v398_v16, %v397_v11  ;;  %v382_v6 = vadd.f32 %v2359_v41, %v337_v51  ;;  %v399_v20 = vadd.f32 %v2359_v41, %v354_v57 }
  0xe1   :  { %1517 = vmatprep.mubr.msk.bf16.mxu1 %vm1753_vm1, %v1752_v0  ;;  %1550 = vmatpush3.bf16.msra.mxu1 %v1736_v61  ;;  %v400_v25 = vadd.f32 %v2359_v41, %v355_v21  ;;  %v357_v35 = vmul.f32 %v2354_v32, %v2294_v34  ;;  %v384_v37 = vadd.f32 %v2359_v41, %v339_v28 }
  0xe2   :  { %1551 = vmatprep.subr.bf16.mxu1 %v1752_v0  ;;  %v414_v23 = vpack.c.bf16 %v382_v6, %v381_v24  ;;  %v401_v30 = vadd.f32 %v2359_v41, %v356_v13  ;;  %v340_v29 = vmul.f32 %v2354_v32, %v2175_v33  ;;  %v341_v34 = vmul.f32 %v2354_v32, %v2182_v36 }
  0xe3   :  { %v423_v31 = vpack.c.bf16 %v400_v25, %v399_v20  ;;  %v402_v9 = vadd.f32 %v2359_v41, %v357_v35  ;;  %v358_v2 = vmul.f32 %v2354_v32, %v2301_v38  ;;  %v359_v55 = vmul.f32 %v2354_v32, %v2308_v43  ;;  %v1741_v43 = vld [vmem:[%s2965_s5 + $0x38] sm:$0xff]  }
  0xe4   :  { %1478 = vmatmul.mubr.msk.bf16.gmra.mrb[8].mxu0 %vm71_vm0, %v411_v26  ;;  %v338_v26 = vmul.f32 %v2354_v32, %v2161_v27  ;;  %v385_v63 = vadd.f32 %v2359_v41, %v340_v29  ;;  %v386_v47 = vadd.f32 %v2359_v41, %v341_v34  ;;  %v2602_v32 = vld [vmem:[%s2968_s4] ss:$0 sm:$0xff] }
  0xe5   :  { %1481 = vmatprep.mubr.msk.bf16.mxu0 %vm1753_vm1, %v1752_v0  ;;  %1552 = vmatpush3.bf16.msra.mxu1 %v1737_v1  ;;  %v424_v40 = vpack.c.bf16 %v402_v9, %v401_v30  ;;  %v403_v33 = vadd.f32 %v2359_v41, %v358_v2  ;;  %v404_v36 = vadd.f32 %v2359_v41, %v359_v55  ;;  %v1743_v9 = vld [vmem:[%s2969_s7 + $0x8] sm:$0xff]   ;;  %v1744_v55 = vld [vmem:[%s2969_s7 + $0x10] sm:$0xff]  }
  0xe6   :  { %1553 = vmatprep.subr.bf16.mxu1 %v1752_v0  ;;  %v383_v27 = vadd.f32 %v2359_v41, %v338_v26  ;;  %v416_v61 = vpack.c.bf16 %v386_v47, %v385_v63 }
  0xe7   :  { %v425_v38 = vpack.c.bf16 %v404_v36, %v403_v33 }
  0xe8   :  { %1518 = vmatmul.mubr.msk.bf16.gmra.mrb[8].mxu1 %vm71_vm0, %v421_v8  ;;  %v415_v12 = vpack.c.bf16 %v384_v37, %v383_v27 }
  0xe9   :  { %1521 = vmatprep.mubr.msk.bf16.mxu1 %vm1753_vm1, %v1752_v0  ;;  %1554 = vmatpush3.bf16.msra.mxu1 %v1738_v45 }
  0xea   :  { %1555 = vmatprep.subr.bf16.mxu1 %v1752_v0 }
  0xec   :  { %1482 = vmatmul.mubr.msk.bf16.gmra.mrb[12].mxu0 %vm71_vm0, %v412_v49 }
  0xed   :  { %1485 = vmatprep.mubr.msk.bf16.mxu0 %vm1753_vm1, %v1752_v0  ;;  %1556 = vmatpush3.bf16.msra.mxu1 %v1739_v54 }
  0xee   :  { %1557 = vmatprep.subr.bf16.mxu1 %v1752_v0 }
  0xf0   :  { %1522 = vmatmul.mubr.msk.bf16.gmra.mrb[12].mxu1 %vm71_vm0, %v422_v19  ;;  %v1742_v19 = vld [vmem:[%s2969_s7] sm:$0xff]  }
  0xf1   :  { %1525 = vmatprep.mubr.msk.bf16.mxu1 %vm1753_vm1, %v1752_v0  ;;  %1558 = vmatpush3.bf16.msra.mxu1 %v1740_v60 }
  0xf2   :  { %1559 = vmatprep.subr.bf16.mxu1 %v1752_v0  ;;  %1638 = vmatpush3.bf16.msra.mxu0 %v1742_v19 }
  0xf3   :  { %1639 = vmatprep.subr.bf16.mxu0 %v1752_v0 }
  0xf4   :  { %1486 = vmatmul.mubr.msk.bf16.gmra.mrb[16].mxu0 %vm71_vm0, %v413_v15 }
  0xf5   :  { %1489 = vmatprep.mubr.msk.bf16.mxu0 %vm1753_vm1, %v1752_v0  ;;  %1560 = vmatpush3.bf16.msra.mxu1 %v1741_v43 }
  0xf6   :  { %1640 = vmatpush3.bf16.msra.mxu0 %v1743_v9 }
  0xf7   :  { %1641 = vmatprep.subr.bf16.mxu0 %v1752_v0 }
  0xf8   :  { %1526 = vmatmul.mubr.msk.bf16.gmra.mrb[16].mxu1 %vm71_vm0, %v423_v31 }
  0xf9   :  { %1529 = vmatprep.mubr.msk.bf16.mxu1 %vm1753_vm1, %v1752_v0 }
  0xfa   :  { %1642 = vmatpush3.bf16.msra.mxu0 %v1744_v55 }
  0xfb   :  { %1643 = vmatprep.subr.bf16.mxu0 %v1752_v0 }
  0xfc   :  { %1490 = vmatmul.mubr.msk.bf16.gmra.mrb[20].mxu0 %vm71_vm0, %v414_v23 }
  0xfd   :  { %1493 = vmatprep.mubr.msk.bf16.mxu0 %vm1753_vm1, %v1752_v0 }
 0x100   :  { %1530 = vmatmul.mubr.msk.bf16.gmra.mrb[20].mxu1 %vm71_vm0, %v424_v40 }
 0x101   :  { %1533 = vmatprep.mubr.msk.bf16.mxu1 %vm1753_vm1, %v1752_v0 }
 0x104   :  { %1494 = vmatmul.mubr.msk.bf16.gmra.mrb[24].mxu0 %vm71_vm0, %v415_v12 }
 0x105   :  { %1497 = vmatprep.mubr.msk.bf16.mxu0 %vm1753_vm1, %v1752_v0 }
 0x108   :  { %1534 = vmatmul.mubr.msk.bf16.gmra.mrb[24].mxu1 %vm71_vm0, %v425_v38 }
 0x109   :  { %1537 = vmatprep.mubr.msk.bf16.mxu1 %vm1753_vm1, %v1752_v0 }
 0x10c   :  { %1498 = vmatmul.mubr.msk.bf16.gmra.mrb[28].mxu0 %vm71_vm0, %v416_v61 }
 0x10d   :  { %1501 = vmatprep.mubr.msk.bf16.mxu0 %vm1753_vm1, %v1752_v0 }
 0x110   :  { %1538 = vmatmul.mubr.msk.bf16.gmra.mrb[28].mxu1 %vm71_vm0, %v426_v5 }
 0x111   :  { %1541 = vmatprep.mubr.msk.bf16.mxu1 %vm1753_vm1, %v1752_v0 }
 0x114   :  { %1502 = vmatmul.mubr.msk.bf16.gmra.mrb[32].mxu0 %vm71_vm0, %v417_v48 }
 0x115   :  { %1505 = vmatprep.mubr.msk.bf16.mxu0 %vm1753_vm1, %v1752_v0 }
 0x118   :  { %1542 = vmatmul.mubr.msk.bf16.gmra.mrb[32].mxu1 %vm71_vm0, %v427_v58 }
 0x119   :  { %1561 = vmatprep.mubr.msk.bf16.mxu1 %vm1753_vm1, %v1752_v0 }
 0x11c   :  { %1506 = vmatmul.mubr.msk.bf16.gmra.mrb[36].mxu0 %vm71_vm0, %v418_v22 }
 0x11d   :  { %1653 = vmatprep.mubr.msk.bf16.mxu0 %vm1753_vm1, %v1752_v0 }
 0x1a7   :  { %v534_v41 = vpop.f32.mrb[0].mxu0 }
 0x1a8   :  { %v535_v62 = vadd.f32 %v2602_v32, %v534_v41  ;;  %v1471_v39 = vpop.f32.mrb[1].mxu0 }
 0x1a9   :  { %v537_v42 = vpop.f32.mrb[2].mxu0  ;;  %v1745_v39 = vld [vmem:[%s2969_s7 + $0x18] sm:$0xff]  }
 0x1aa   :  { %v538_v10 = vadd.f32 %v2602_v32, %v537_v42  ;;  %v1472_v48 = vpop.f32.mrb[3].mxu0  ;;  %v685_v22 = vmax.f32 %v535_v62, 0.0  ;;  %1644 = vmatpush3.bf16.msra.mxu0 %v1745_v39 }
 0x1ab   :  { %v614_v49 = vpop.f32.mrb[0].mxu1  ;;  %1645 = vmatprep.subr.bf16.mxu0 %v1752_v0 }
 0x1ac   :  { %v686_v52 = vmax.f32 %v538_v10, 0.0  ;;  %v615_v50 = vadd.f32 %v2602_v32, %v614_v49  ;;  %v1511_v59 = vpop.f32.mrb[1].mxu1 }
 0x1ad   :  { %v617_v53 = vpop.f32.mrb[2].mxu1 }
 0x1ae   :  { %v723_v3 = vpack.c.bf16 %v686_v52, %v685_v22  ;;  %v705_v17 = vmax.f32 %v615_v50, 0.0  ;;  %v618_v18 = vadd.f32 %v2602_v32, %v617_v53  ;;  %v1512_v4 = vpop.f32.mrb[3].mxu1 }
 0x1af   :  { %v542_v7 = vpop.f32.mrb[4].mxu0 }
 0x1b0   :  { %v543_v56 = vadd.f32 %v2602_v32, %v542_v7  ;;  %v1475_v5 = vpop.f32.mrb[5].mxu0  ;;  %1562 = vmatmul.mubr.bf16.vlgmr.msra.gmra.mrb[36].mxu1 %v723_v3  ;;  %v706_v16 = vmax.f32 %v618_v18, 0.0  ;;  %v1747_v18 = vld [vmem:[%s2969_s7 + $0x28] sm:$0xff]  }
 0x1b1   :  { %v545_v44 = vpop.f32.mrb[6].mxu0  ;;  %1565 = vmatprep.mubr.msk.bf16.mxu1 %vm1753_vm1, %v1752_v0 }
 0x1b2   :  { %v546_v46 = vadd.f32 %v2602_v32, %v545_v44  ;;  %v1476_v58 = vpop.f32.mrb[7].mxu0  ;;  %v687_v1 = vmax.f32 %v543_v56, 0.0  ;;  %v2615_v54 = vpack.c.bf16 %v706_v16, %v705_v17  ;;  %v1746_v44 = vld [vmem:[%s2969_s7 + $0x20] sm:$0xff]  }
 0x1b3   :  { %v622_v24 = vpop.f32.mrb[4].mxu1  ;;  %1646 = vmatpush3.bf16.msra.mxu0 %v1746_v44 }
 0x1b4   :  { %v688_v8 = vmax.f32 %v546_v46, 0.0  ;;  %v623_v60 = vadd.f32 %v2602_v32, %v622_v24  ;;  %v1515_v20 = vpop.f32.mrb[5].mxu1  ;;  %1647 = vmatprep.subr.bf16.mxu0 %v1752_v0 }
 0x1b5   :  { %v625_v23 = vpop.f32.mrb[6].mxu1 }
 0x1b6   :  { %v724_v45 = vpack.c.bf16 %v688_v8, %v687_v1  ;;  %v707_v26 = vmax.f32 %v623_v60, 0.0  ;;  %v626_v28 = vadd.f32 %v2602_v32, %v625_v23  ;;  %v1516_v31 = vpop.f32.mrb[7].mxu1 }
 0x1b7   :  { %v550_v11 = vpop.f32.mrb[8].mxu0  ;;  %1648 = vmatpush3.bf16.msra.mxu0 %v1747_v18 }
 0x1b8   :  { %v551_v15 = vadd.f32 %v2602_v32, %v550_v11  ;;  %v1479_v14 = vpop.f32.mrb[9].mxu0  ;;  %1566 = vmatmul.mubr.bf16.gmra.mrb[40].mxu1 %v724_v45  ;;  %v708_v27 = vmax.f32 %v626_v28, 0.0  ;;  %1649 = vmatprep.subr.bf16.mxu0 %v1752_v0 }
 0x1b9   :  { %v553_v51 = vpop.f32.mrb[10].mxu0  ;;  %1569 = vmatprep.mubr.msk.bf16.mxu1 %vm1753_vm1, %v1752_v0 }
 0x1ba   :  { %v554_v57 = vadd.f32 %v2602_v32, %v553_v51  ;;  %v1480_v21 = vpop.f32.mrb[11].mxu0  ;;  %v689_v6 = vmax.f32 %v551_v15, 0.0  ;;  %v2630_v29 = vpack.c.bf16 %v708_v27, %v707_v26 }
 0x1bb   :  { %v630_v2 = vpop.f32.mrb[8].mxu1  ;;  %v1748_v21 = vld [vmem:[%s2969_s7 + $0x30] sm:$0xff]  }
 0x1bc   :  { %v690_v25 = vmax.f32 %v554_v57, 0.0  ;;  %v631_v63 = vadd.f32 %v2602_v32, %v630_v2  ;;  %v1519_v47 = vpop.f32.mrb[9].mxu1  ;;  %1650 = vmatpush3.bf16.msra.mxu0 %v1748_v21 }
 0x1bd   :  { %v633_v61 = vpop.f32.mrb[10].mxu1  ;;  %1651 = vmatprep.subr.bf16.mxu0 %v1752_v0 }
 0x1be   :  { %v725_v13 = vpack.c.bf16 %v690_v25, %v689_v6  ;;  %v709_v38 = vmax.f32 %v631_v63, 0.0  ;;  %v634_v43 = vadd.f32 %v2602_v32, %v633_v61  ;;  %v1520_v41 = vpop.f32.mrb[11].mxu1 }
 0x1bf   :  { %v558_v35 = vpop.f32.mrb[12].mxu0 }
 0x1c0   :  { %v559_v37 = vadd.f32 %v2602_v32, %v558_v35  ;;  %v1483_v30 = vpop.f32.mrb[13].mxu0  ;;  %1570 = vmatmul.mubr.bf16.gmra.mrb[44].mxu1 %v725_v13  ;;  %v710_v10 = vmax.f32 %v634_v43, 0.0  ;;  %v1749_v13 = vld [vmem:[%s2969_s7 + $0x38] sm:$0xff]  }
 0x1c1   :  { %v561_v12 = vpop.f32.mrb[14].mxu0  ;;  %1573 = vmatprep.mubr.msk.bf16.mxu1 %vm1753_vm1, %v1752_v0  ;;  %1652 = vmatpush3.bf16.msra.mxu0 %v1749_v13 }
 0x1c2   :  { %v562_v34 = vadd.f32 %v2602_v32, %v561_v12  ;;  %v1484_v40 = vpop.f32.mrb[15].mxu0  ;;  %v691_v33 = vmax.f32 %v559_v37, 0.0  ;;  %v2646_v3 = vpack.c.bf16 %v710_v10, %v709_v38 }
 0x1c3   :  { %v638_v5 = vpop.f32.mrb[12].mxu1 }
 0x1c4   :  { %v692_v36 = vmax.f32 %v562_v34, 0.0  ;;  %v639_v46 = vadd.f32 %v2602_v32, %v638_v5  ;;  %v1523_v58 = vpop.f32.mrb[13].mxu1 }
 0x1c5   :  { %v641_v59 = vpop.f32.mrb[14].mxu1 }
 0x1c6   :  { %v726_v62 = vpack.c.bf16 %v692_v36, %v691_v33  ;;  %v711_v1 = vmax.f32 %v639_v46, 0.0  ;;  %v642_v8 = vadd.f32 %v2602_v32, %v641_v59  ;;  %v1524_v53 = vpop.f32.mrb[15].mxu1 }
 0x1c7   :  { %v566_v42 = vpop.f32.mrb[16].mxu0 }
 0x1c8   :  { %v567_v48 = vadd.f32 %v2602_v32, %v566_v42  ;;  %v1487_v22 = vpop.f32.mrb[17].mxu0  ;;  %1574 = vmatmul.mubr.bf16.gmra.mrb[48].mxu1 %v726_v62  ;;  %v712_v45 = vmax.f32 %v642_v8, 0.0 }
 0x1c9   :  { %v569_v52 = vpop.f32.mrb[18].mxu0  ;;  %1577 = vmatprep.mubr.msk.bf16.mxu1 %vm1753_vm1, %v1752_v0 }
 0x1ca   :  { %v570_v7 = vadd.f32 %v2602_v32, %v569_v52  ;;  %v1488_v56 = vpop.f32.mrb[19].mxu0  ;;  %v693_v49 = vmax.f32 %v567_v48, 0.0  ;;  %v2662_v14 = vpack.c.bf16 %v712_v45, %v711_v1 }
 0x1cb   :  { %v646_v57 = vpop.f32.mrb[16].mxu1 }
 0x1cc   :  { %v694_v50 = vmax.f32 %v570_v7, 0.0  ;;  %v647_v24 = vadd.f32 %v2602_v32, %v646_v57  ;;  %v1527_v6 = vpop.f32.mrb[17].mxu1 }
 0x1cd   :  { %v649_v25 = vpop.f32.mrb[18].mxu1 }
 0x1ce   :  { %v727_v17 = vpack.c.bf16 %v694_v50, %v693_v49  ;;  %v713_v23 = vmax.f32 %v647_v24, 0.0  ;;  %v650_v26 = vadd.f32 %v2602_v32, %v649_v25  ;;  %v1528_v28 = vpop.f32.mrb[19].mxu1 }
 0x1cf   :  { %v574_v4 = vpop.f32.mrb[20].mxu0 }
 0x1d0   :  { %v575_v11 = vadd.f32 %v2602_v32, %v574_v4  ;;  %v1491_v16 = vpop.f32.mrb[21].mxu0  ;;  %1578 = vmatmul.mubr.bf16.gmra.mrb[52].mxu1 %v727_v17  ;;  %v714_v27 = vmax.f32 %v650_v26, 0.0 }
 0x1d1   :  { %v577_v15 = vpop.f32.mrb[22].mxu0  ;;  %1581 = vmatprep.mubr.msk.bf16.mxu1 %vm1753_vm1, %v1752_v0 }
 0x1d2   :  { %v578_v51 = vadd.f32 %v2602_v32, %v577_v15  ;;  %v1492_v19 = vpop.f32.mrb[23].mxu0  ;;  %v695_v60 = vmax.f32 %v575_v11, 0.0  ;;  %v2678_v12 = vpack.c.bf16 %v714_v27, %v713_v23 }
 0x1d3   :  { %v654_v2 = vpop.f32.mrb[20].mxu1 }
 0x1d4   :  { %v696_v20 = vmax.f32 %v578_v51, 0.0  ;;  %v655_v55 = vadd.f32 %v2602_v32, %v654_v2  ;;  %v1531_v63 = vpop.f32.mrb[21].mxu1 }
 0x1d5   :  { %v657_v36 = vpop.f32.mrb[22].mxu1 }
 0x1d6   :  { %v728_v31 = vpack.c.bf16 %v696_v20, %v695_v60  ;;  %v715_v61 = vmax.f32 %v655_v55, 0.0  ;;  %v658_v38 = vadd.f32 %v2602_v32, %v657_v36  ;;  %v1532_v43 = vpop.f32.mrb[23].mxu1 }
 0x1d7   :  { %v582_v35 = vpop.f32.mrb[24].mxu0 }
 0x1d8   :  { %v583_v37 = vadd.f32 %v2602_v32, %v582_v35  ;;  %v1495_v30 = vpop.f32.mrb[25].mxu0  ;;  %1582 = vmatmul.mubr.bf16.gmra.mrb[56].mxu1 %v728_v31  ;;  %v716_v39 = vmax.f32 %v658_v38, 0.0 }
 0x1d9   :  { %v585_v9 = vpop.f32.mrb[26].mxu0  ;;  %1585 = vmatprep.mubr.msk.bf16.mxu1 %vm1753_vm1, %v1752_v0 }
 0x1da   :  { %v586_v34 = vadd.f32 %v2602_v32, %v585_v9  ;;  %v1496_v40 = vpop.f32.mrb[27].mxu0  ;;  %v697_v47 = vmax.f32 %v583_v37, 0.0  ;;  %v2686_v22 = vpack.c.bf16 %v716_v39, %v715_v61 }
 0x1db   :  { %v662_v56 = vpop.f32.mrb[24].mxu1 }
 0x1dc   :  { %v698_v33 = vmax.f32 %v586_v34, 0.0  ;;  %v663_v5 = vadd.f32 %v2602_v32, %v662_v56  ;;  %v1535_v44 = vpop.f32.mrb[25].mxu1 }
 0x1dd   :  { %v665_v49 = vpop.f32.mrb[26].mxu1 }
 0x1de   :  { %v729_v41 = vpack.c.bf16 %v698_v33, %v697_v47  ;;  %v717_v50 = vmax.f32 %v663_v5, 0.0  ;;  %v666_v59 = vadd.f32 %v2602_v32, %v665_v49  ;;  %v1536_v1 = vpop.f32.mrb[27].mxu1 }
 0x1df   :  { %v590_v62 = vpop.f32.mrb[28].mxu0 }
 0x1e0   :  { %v591_v42 = vadd.f32 %v2602_v32, %v590_v62  ;;  %v1499_v10 = vpop.f32.mrb[29].mxu0  ;;  %1586 = vmatmul.mubr.bf16.gmra.mrb[60].mxu1 %v729_v41  ;;  %v718_v17 = vmax.f32 %v666_v59, 0.0 }
 0x1e1   :  { %v593_v48 = vpop.f32.mrb[30].mxu0  ;;  %1589 = vmatprep.mubr.msk.bf16.mxu1 %vm1753_vm1, %v1752_v0 }
 0x1e2   :  { %v594_v52 = vadd.f32 %v2602_v32, %v593_v48  ;;  %v1500_v7 = vpop.f32.mrb[31].mxu0  ;;  %v699_v46 = vmax.f32 %v591_v42, 0.0  ;;  %v739_v11 = vpack.c.bf16 %v718_v17, %v717_v50 }
 0x1e3   :  { %v670_v51 = vpop.f32.mrb[28].mxu1 }
 0x1e4   :  { %v700_v58 = vmax.f32 %v594_v52, 0.0  ;;  %v671_v19 = vadd.f32 %v2602_v32, %v670_v51  ;;  %v1539_v57 = vpop.f32.mrb[29].mxu1 }
 0x1e5   :  { %v673_v6 = vpop.f32.mrb[30].mxu1 }
 0x1e6   :  { %v730_v8 = vpack.c.bf16 %v700_v58, %v699_v46  ;;  %v719_v60 = vmax.f32 %v671_v19, 0.0  ;;  %v674_v20 = vadd.f32 %v2602_v32, %v673_v6  ;;  %v1540_v25 = vpop.f32.mrb[31].mxu1 }
 0x1e7   :  { %v598_v53 = vpop.f32.mrb[32].mxu0 }
 0x1e8   :  { %v599_v18 = vadd.f32 %v2602_v32, %v598_v53  ;;  %v1503_v4 = vpop.f32.mrb[33].mxu0  ;;  %1590 = vmatmul.mubr.bf16.gmra.mrb[64].mxu1 %v730_v8  ;;  %v720_v28 = vmax.f32 %v674_v20, 0.0 }
 0x1e9   :  { %v601_v45 = vpop.f32.mrb[34].mxu0  ;;  %1593 = vmatprep.mubr.msk.bf16.mxu1 %vm1753_vm1, %v1752_v0 }
 0x1ea   :  { %v602_v16 = vadd.f32 %v2602_v32, %v601_v45  ;;  %v1504_v15 = vpop.f32.mrb[35].mxu0  ;;  %v701_v21 = vmax.f32 %v599_v18, 0.0  ;;  %v740_v27 = vpack.c.bf16 %v720_v28, %v719_v60 }
 0x1eb   :  { %v678_v9 = vpop.f32.mrb[32].mxu1 }
 0x1ec   :  { %v702_v24 = vmax.f32 %v602_v16, 0.0  ;;  %v679_v34 = vadd.f32 %v2602_v32, %v678_v9  ;;  %v1543_v40 = vpop.f32.mrb[33].mxu1 }
 0x1ed   :  { %v681_v63 = vpop.f32.mrb[34].mxu1 }
 0x1ee   :  { %v731_v23 = vpack.c.bf16 %v702_v24, %v701_v21  ;;  %v721_v47 = vmax.f32 %v679_v34, 0.0  ;;  %v682_v33 = vadd.f32 %v2602_v32, %v681_v63  ;;  %v1544_v36 = vpop.f32.mrb[35].mxu1 }
 0x1ef   :  { %v606_v26 = vpop.f32.mrb[36].mxu0 }
 0x1f0   :  { %v607_v31 = vadd.f32 %v2602_v32, %v606_v26  ;;  %v1507_v13 = vpop.f32.mrb[37].mxu0  ;;  %1594 = vmatmul.mubr.bf16.gmra.mrb[68].mxu1 %v731_v23  ;;  %v722_v38 = vmax.f32 %v682_v33, 0.0 }
 0x1f1   :  { %v609_v35 = vpop.f32.mrb[38].mxu0  ;;  %1597 = vmatprep.mubr.msk.bf16.mxu1 %vm1753_vm1, %v1752_v0 }
 0x1f2   :  { %v610_v37 = vadd.f32 %v2602_v32, %v609_v35  ;;  %v1508_v30 = vpop.f32.mrb[39].mxu0  ;;  %v703_v2 = vmax.f32 %v607_v31, 0.0  ;;  %v741_v43 = vpack.c.bf16 %v722_v38, %v721_v47  ;;  %v2730_v32 = vld [vmem:[%s2970_s6] ss:$0 sm:$0xff] }
 0x1f4   :  { %v704_v55 = vmax.f32 %v610_v37, 0.0 }
 0x1f6   :  { %v732_v61 = vpack.c.bf16 %v704_v55, %v703_v2 }
 0x1f8   :  { %1598 = vmatmul.mubr.bf16.gmra.mrb[72].mxu1 %v732_v61 }
 0x1f9   :  { %1601 = vmatprep.mubr.msk.bf16.mxu1 %vm1753_vm1, %v1752_v0 }
 0x200   :  { %1602 = vmatmul.mubr.bf16.gmra.mrb[76].mxu1 %v2615_v54 }
 0x201   :  { %1605 = vmatprep.mubr.msk.bf16.mxu1 %vm1753_vm1, %v1752_v0 }
 0x208   :  { %1606 = vmatmul.mubr.bf16.gmra.mrb[80].mxu1 %v2630_v29 }
 0x209   :  { %1609 = vmatprep.mubr.msk.bf16.mxu1 %vm1753_vm1, %v1752_v0 }
 0x210   :  { %1610 = vmatmul.mubr.bf16.gmra.mrb[84].mxu1 %v2646_v3 }
 0x211   :  { %1613 = vmatprep.mubr.msk.bf16.mxu1 %vm1753_vm1, %v1752_v0 }
 0x218   :  { %1614 = vmatmul.mubr.bf16.gmra.mrb[88].mxu1 %v2662_v14 }
 0x219   :  { %1617 = vmatprep.mubr.msk.bf16.mxu1 %vm1753_vm1, %v1752_v0 }
 0x220   :  { %1618 = vmatmul.mubr.bf16.gmra.mrb[92].mxu1 %v2678_v12 }
 0x221   :  { %1621 = vmatprep.mubr.msk.bf16.mxu1 %vm1753_vm1, %v1752_v0 }
 0x228   :  { %1622 = vmatmul.mubr.bf16.gmra.mrb[96].mxu1 %v2686_v22 }
 0x229   :  { %1625 = vmatprep.mubr.msk.bf16.mxu1 %vm1753_vm1, %v1752_v0 }
 0x230   :  { %1626 = vmatmul.mubr.bf16.gmra.mrb[100].mxu1 %v739_v11 }
 0x231   :  { %1629 = vmatprep.mubr.msk.bf16.mxu1 %vm1753_vm1, %v1752_v0 }
 0x238   :  { %1630 = vmatmul.mubr.bf16.gmra.mrb[104].mxu1 %v740_v27 }
 0x239   :  { %1633 = vmatprep.mubr.msk.bf16.mxu1 %vm1753_vm1, %v1752_v0 }
 0x240   :  { %1634 = vmatmul.mubr.bf16.gmra.mrb[108].mxu1 %v741_v43 }
 0x283   :  { %v847_v54 = vpop.f32.mrb[36].mxu1 }
 0x284   :  { %v848_v29 = vadd.f32 %v2730_v32, %v847_v54  ;;  %v1563_v3 = vpop.f32.mrb[37].mxu1 }
 0x285   :  { %v850_v14 = vpop.f32.mrb[38].mxu1 }
 0x286   :  { %v851_v12 = vadd.f32 %v2730_v32, %v850_v14  ;;  %v1564_v41 = vpop.f32.mrb[39].mxu1  ;;  %v998_v62 = vmax.f32 %v848_v29, 0.0 }
 0x288   :  { %v999_v39 = vmax.f32 %v851_v12, 0.0 }
 0x28a   :  { %v1036_v42 = vpack.c.bf16 %v999_v39, %v998_v62 }
 0x28b   :  { %v855_v10 = vpop.f32.mrb[40].mxu1 }
 0x28c   :  { %v856_v48 = vadd.f32 %v2730_v32, %v855_v10  ;;  %v1567_v22 = vpop.f32.mrb[41].mxu1  ;;  %1654 = vmatmul.mubr.bf16.vlgmr.msra.gmra.mrb[40].mxu0 %v1036_v42 }
 0x28d   :  { %v858_v52 = vpop.f32.mrb[42].mxu1  ;;  %1657 = vmatprep.mubr.msk.bf16.mxu0 %vm1753_vm1, %v1752_v0 }
 0x28e   :  { %v859_v7 = vadd.f32 %v2730_v32, %v858_v52  ;;  %v1568_v56 = vpop.f32.mrb[43].mxu1  ;;  %v1000_v5 = vmax.f32 %v856_v48, 0.0 }
 0x290   :  { %v1001_v44 = vmax.f32 %v859_v7, 0.0 }
 0x292   :  { %v1037_v46 = vpack.c.bf16 %v1001_v44, %v1000_v5 }
 0x293   :  { %v863_v58 = vpop.f32.mrb[44].mxu1 }
 0x294   :  { %v864_v49 = vadd.f32 %v2730_v32, %v863_v58  ;;  %v1571_v50 = vpop.f32.mrb[45].mxu1  ;;  %1658 = vmatmul.mubr.bf16.gmra.mrb[44].mxu0 %v1037_v46 }
 0x295   :  { %v866_v59 = vpop.f32.mrb[46].mxu1  ;;  %1661 = vmatprep.mubr.msk.bf16.mxu0 %vm1753_vm1, %v1752_v0 }
 0x296   :  { %v867_v1 = vadd.f32 %v2730_v32, %v866_v59  ;;  %v1572_v8 = vpop.f32.mrb[47].mxu1  ;;  %v1002_v53 = vmax.f32 %v864_v49, 0.0 }
 0x298   :  { %v1003_v17 = vmax.f32 %v867_v1, 0.0 }
 0x29a   :  { %v1038_v18 = vpack.c.bf16 %v1003_v17, %v1002_v53 }
 0x29b   :  { %v871_v4 = vpop.f32.mrb[48].mxu1 }
 0x29c   :  { %v872_v45 = vadd.f32 %v2730_v32, %v871_v4  ;;  %v1575_v11 = vpop.f32.mrb[49].mxu1  ;;  %1662 = vmatmul.mubr.bf16.gmra.mrb[48].mxu0 %v1038_v18 }
 0x29d   :  { %v874_v16 = vpop.f32.mrb[50].mxu1  ;;  %1665 = vmatprep.mubr.msk.bf16.mxu0 %vm1753_vm1, %v1752_v0 }
 0x29e   :  { %v875_v15 = vadd.f32 %v2730_v32, %v874_v16  ;;  %v1576_v51 = vpop.f32.mrb[51].mxu1  ;;  %v1004_v19 = vmax.f32 %v872_v45, 0.0 }
 0x2a0   :  { %v1005_v57 = vmax.f32 %v875_v15, 0.0 }
 0x2a2   :  { %v1039_v21 = vpack.c.bf16 %v1005_v57, %v1004_v19 }
 0x2a3   :  { %v879_v24 = vpop.f32.mrb[52].mxu1 }
 0x2a4   :  { %v880_v6 = vadd.f32 %v2730_v32, %v879_v24  ;;  %v1579_v60 = vpop.f32.mrb[53].mxu1  ;;  %1666 = vmatmul.mubr.bf16.gmra.mrb[52].mxu0 %v1039_v21 }
 0x2a5   :  { %v882_v20 = vpop.f32.mrb[54].mxu1  ;;  %1669 = vmatprep.mubr.msk.bf16.mxu0 %vm1753_vm1, %v1752_v0 }
 0x2a6   :  { %v883_v25 = vadd.f32 %v2730_v32, %v882_v20  ;;  %v1580_v23 = vpop.f32.mrb[55].mxu1  ;;  %v1006_v26 = vmax.f32 %v880_v6, 0.0 }
 0x2a8   :  { %v1007_v28 = vmax.f32 %v883_v25, 0.0 }
 0x2aa   :  { %v1040_v31 = vpack.c.bf16 %v1007_v28, %v1006_v26 }
 0x2ab   :  { %v887_v13 = vpop.f32.mrb[56].mxu1 }
 0x2ac   :  { %v888_v35 = vadd.f32 %v2730_v32, %v887_v13  ;;  %v1583_v27 = vpop.f32.mrb[57].mxu1  ;;  %1670 = vmatmul.mubr.bf16.gmra.mrb[56].mxu0 %v1040_v31 }
 0x2ad   :  { %v890_v37 = vpop.f32.mrb[58].mxu1  ;;  %1673 = vmatprep.mubr.msk.bf16.mxu0 %vm1753_vm1, %v1752_v0 }
 0x2ae   :  { %v891_v30 = vadd.f32 %v2730_v32, %v890_v37  ;;  %v1584_v9 = vpop.f32.mrb[59].mxu1  ;;  %v1008_v34 = vmax.f32 %v888_v35, 0.0 }
 0x2b0   :  { %v1009_v40 = vmax.f32 %v891_v30, 0.0 }
 0x2b2   :  { %v1041_v2 = vpack.c.bf16 %v1009_v40, %v1008_v34 }
 0x2b3   :  { %v895_v55 = vpop.f32.mrb[60].mxu1 }
 0x2b4   :  { %v896_v63 = vadd.f32 %v2730_v32, %v895_v55  ;;  %v1587_v47 = vpop.f32.mrb[61].mxu1  ;;  %1674 = vmatmul.mubr.bf16.gmra.mrb[60].mxu0 %v1041_v2 }
 0x2b5   :  { %v898_v33 = vpop.f32.mrb[62].mxu1  ;;  %1677 = vmatprep.mubr.msk.bf16.mxu0 %vm1753_vm1, %v1752_v0 }
 0x2b6   :  { %v899_v36 = vadd.f32 %v2730_v32, %v898_v33  ;;  %v1588_v61 = vpop.f32.mrb[63].mxu1  ;;  %v1010_v38 = vmax.f32 %v896_v63, 0.0 }
 0x2b8   :  { %v1011_v43 = vmax.f32 %v899_v36, 0.0 }
 0x2ba   :  { %v1042_v54 = vpack.c.bf16 %v1011_v43, %v1010_v38 }
 0x2bb   :  { %v903_v29 = vpop.f32.mrb[64].mxu1 }
 0x2bc   :  { %v904_v3 = vadd.f32 %v2730_v32, %v903_v29  ;;  %v1591_v14 = vpop.f32.mrb[65].mxu1  ;;  %1678 = vmatmul.mubr.bf16.gmra.mrb[64].mxu0 %v1042_v54 }
 0x2bd   :  { %v906_v12 = vpop.f32.mrb[66].mxu1  ;;  %1681 = vmatprep.mubr.msk.bf16.mxu0 %vm1753_vm1, %v1752_v0 }
 0x2be   :  { %v907_v41 = vadd.f32 %v2730_v32, %v906_v12  ;;  %v1592_v62 = vpop.f32.mrb[67].mxu1  ;;  %v1012_v39 = vmax.f32 %v904_v3, 0.0 }
 0x2c0   :  { %v1013_v42 = vmax.f32 %v907_v41, 0.0 }
 0x2c2   :  { %v1043_v10 = vpack.c.bf16 %v1013_v42, %v1012_v39 }
 0x2c3   :  { %v911_v48 = vpop.f32.mrb[68].mxu1 }
 0x2c4   :  { %v912_v22 = vadd.f32 %v2730_v32, %v911_v48  ;;  %v1595_v52 = vpop.f32.mrb[69].mxu1  ;;  %1682 = vmatmul.mubr.bf16.gmra.mrb[68].mxu0 %v1043_v10 }
 0x2c5   :  { %v914_v7 = vpop.f32.mrb[70].mxu1  ;;  %1685 = vmatprep.mubr.msk.bf16.mxu0 %vm1753_vm1, %v1752_v0 }
 0x2c6   :  { %v915_v56 = vadd.f32 %v2730_v32, %v914_v7  ;;  %v1596_v5 = vpop.f32.mrb[71].mxu1  ;;  %v1014_v44 = vmax.f32 %v912_v22, 0.0 }
 0x2c8   :  { %v1015_v46 = vmax.f32 %v915_v56, 0.0 }
 0x2ca   :  { %v1044_v58 = vpack.c.bf16 %v1015_v46, %v1014_v44 }
 0x2cb   :  { %v919_v49 = vpop.f32.mrb[72].mxu1 }
 0x2cc   :  { %v920_v50 = vadd.f32 %v2730_v32, %v919_v49  ;;  %v1599_v59 = vpop.f32.mrb[73].mxu1  ;;  %1686 = vmatmul.mubr.bf16.gmra.mrb[72].mxu0 %v1044_v58 }
 0x2cd   :  { %v922_v1 = vpop.f32.mrb[74].mxu1  ;;  %1689 = vmatprep.mubr.msk.bf16.mxu0 %vm1753_vm1, %v1752_v0 }
 0x2ce   :  { %v923_v8 = vadd.f32 %v2730_v32, %v922_v1  ;;  %v1600_v53 = vpop.f32.mrb[75].mxu1  ;;  %v1016_v17 = vmax.f32 %v920_v50, 0.0 }
 0x2d0   :  { %v1017_v18 = vmax.f32 %v923_v8, 0.0 }
 0x2d2   :  { %v1045_v4 = vpack.c.bf16 %v1017_v18, %v1016_v17 }
 0x2d3   :  { %v927_v45 = vpop.f32.mrb[76].mxu1 }
 0x2d4   :  { %v928_v11 = vadd.f32 %v2730_v32, %v927_v45  ;;  %v1603_v16 = vpop.f32.mrb[77].mxu1  ;;  %1690 = vmatmul.mubr.bf16.gmra.mrb[76].mxu0 %v1045_v4 }
 0x2d5   :  { %v930_v15 = vpop.f32.mrb[78].mxu1  ;;  %1693 = vmatprep.mubr.msk.bf16.mxu0 %vm1753_vm1, %v1752_v0 }
 0x2d6   :  { %v931_v51 = vadd.f32 %v2730_v32, %v930_v15  ;;  %v1604_v19 = vpop.f32.mrb[79].mxu1  ;;  %v1018_v57 = vmax.f32 %v928_v11, 0.0 }
 0x2d8   :  { %v1019_v21 = vmax.f32 %v931_v51, 0.0 }
 0x2da   :  { %v1046_v24 = vpack.c.bf16 %v1019_v21, %v1018_v57 }
 0x2db   :  { %v935_v6 = vpop.f32.mrb[80].mxu1 }
 0x2dc   :  { %v936_v60 = vadd.f32 %v2730_v32, %v935_v6  ;;  %v1607_v20 = vpop.f32.mrb[81].mxu1  ;;  %1694 = vmatmul.mubr.bf16.gmra.mrb[80].mxu0 %v1046_v24 }
 0x2dd   :  { %v938_v25 = vpop.f32.mrb[82].mxu1  ;;  %1697 = vmatprep.mubr.msk.bf16.mxu0 %vm1753_vm1, %v1752_v0 }
 0x2de   :  { %v939_v23 = vadd.f32 %v2730_v32, %v938_v25  ;;  %v1608_v26 = vpop.f32.mrb[83].mxu1  ;;  %v1020_v28 = vmax.f32 %v936_v60, 0.0 }
 0x2e0   :  { %v1021_v31 = vmax.f32 %v939_v23, 0.0 }
 0x2e2   :  { %v1047_v13 = vpack.c.bf16 %v1021_v31, %v1020_v28 }
 0x2e3   :  { %v943_v35 = vpop.f32.mrb[84].mxu1 }
 0x2e4   :  { %v944_v27 = vadd.f32 %v2730_v32, %v943_v35  ;;  %v1611_v37 = vpop.f32.mrb[85].mxu1  ;;  %1698 = vmatmul.mubr.bf16.gmra.mrb[84].mxu0 %v1047_v13 }
 0x2e5   :  { %v946_v30 = vpop.f32.mrb[86].mxu1  ;;  %1701 = vmatprep.mubr.msk.bf16.mxu0 %vm1753_vm1, %v1752_v0 }
 0x2e6   :  { %v947_v9 = vadd.f32 %v2730_v32, %v946_v30  ;;  %v1612_v34 = vpop.f32.mrb[87].mxu1  ;;  %v1022_v40 = vmax.f32 %v944_v27, 0.0  ;;  %v2809_v27 = vld [vmem:[%s2971_s8] ss:$0 sm:$0xff] }
 0x2e8   :  { %v1023_v2 = vmax.f32 %v947_v9, 0.0 }
 0x2ea   :  { %v1048_v55 = vpack.c.bf16 %v1023_v2, %v1022_v40 }
 0x2eb   :  { %v951_v63 = vpop.f32.mrb[88].mxu1 }
 0x2ec   :  { %v952_v47 = vadd.f32 %v2730_v32, %v951_v63  ;;  %v1615_v33 = vpop.f32.mrb[89].mxu1  ;;  %1702 = vmatmul.mubr.bf16.gmra.mrb[88].mxu0 %v1048_v55 }
 0x2ed   :  { %v954_v36 = vpop.f32.mrb[90].mxu1  ;;  %1705 = vmatprep.mubr.msk.bf16.mxu0 %vm1753_vm1, %v1752_v0 }
 0x2ee   :  { %v955_v61 = vadd.f32 %v2730_v32, %v954_v36  ;;  %v1616_v38 = vpop.f32.mrb[91].mxu1  ;;  %v1024_v43 = vmax.f32 %v952_v47, 0.0 }
 0x2f0   :  { %v1025_v54 = vmax.f32 %v955_v61, 0.0 }
 0x2f2   :  { %v1049_v29 = vpack.c.bf16 %v1025_v54, %v1024_v43 }
 0x2f3   :  { %v959_v3 = vpop.f32.mrb[92].mxu1 }
 0x2f4   :  { %v960_v14 = vadd.f32 %v2730_v32, %v959_v3  ;;  %v1619_v12 = vpop.f32.mrb[93].mxu1  ;;  %1706 = vmatmul.mubr.bf16.gmra.mrb[92].mxu0 %v1049_v29 }
 0x2f5   :  { %v962_v41 = vpop.f32.mrb[94].mxu1  ;;  %1709 = vmatprep.mubr.msk.bf16.mxu0 %vm1753_vm1, %v1752_v0 }
 0x2f6   :  { %v963_v62 = vadd.f32 %v2730_v32, %v962_v41  ;;  %v1620_v39 = vpop.f32.mrb[95].mxu1  ;;  %v1026_v42 = vmax.f32 %v960_v14, 0.0 }
 0x2f8   :  { %v1027_v10 = vmax.f32 %v963_v62, 0.0 }
 0x2fa   :  { %v1050_v48 = vpack.c.bf16 %v1027_v10, %v1026_v42 }
 0x2fb   :  { %v967_v22 = vpop.f32.mrb[96].mxu1 }
 0x2fc   :  { %v968_v52 = vadd.f32 %v2730_v32, %v967_v22  ;;  %v1623_v7 = vpop.f32.mrb[97].mxu1  ;;  %1710 = vmatmul.mubr.bf16.gmra.mrb[96].mxu0 %v1050_v48 }
 0x2fd   :  { %v970_v56 = vpop.f32.mrb[98].mxu1  ;;  %1713 = vmatprep.mubr.msk.bf16.mxu0 %vm1753_vm1, %v1752_v0 }
 0x2fe   :  { %v971_v5 = vadd.f32 %v2730_v32, %v970_v56  ;;  %v1624_v44 = vpop.f32.mrb[99].mxu1  ;;  %v1028_v46 = vmax.f32 %v968_v52, 0.0 }
 0x300   :  { %v1029_v58 = vmax.f32 %v971_v5, 0.0 }
 0x302   :  { %v1051_v49 = vpack.c.bf16 %v1029_v58, %v1028_v46 }
 0x303   :  { %v975_v50 = vpop.f32.mrb[100].mxu1 }
 0x304   :  { %v976_v59 = vadd.f32 %v2730_v32, %v975_v50  ;;  %v1627_v1 = vpop.f32.mrb[101].mxu1  ;;  %1714 = vmatmul.mubr.bf16.gmra.mrb[100].mxu0 %v1051_v49 }
 0x305   :  { %v978_v8 = vpop.f32.mrb[102].mxu1  ;;  %1717 = vmatprep.mubr.msk.bf16.mxu0 %vm1753_vm1, %v1752_v0 }
 0x306   :  { %v979_v53 = vadd.f32 %v2730_v32, %v978_v8  ;;  %v1628_v17 = vpop.f32.mrb[103].mxu1  ;;  %v1030_v18 = vmax.f32 %v976_v59, 0.0 }
 0x308   :  { %v1031_v4 = vmax.f32 %v979_v53, 0.0 }
 0x30a   :  { %v1052_v45 = vpack.c.bf16 %v1031_v4, %v1030_v18 }
 0x30b   :  { %v983_v11 = vpop.f32.mrb[104].mxu1 }
 0x30c   :  { %v984_v16 = vadd.f32 %v2730_v32, %v983_v11  ;;  %v1631_v15 = vpop.f32.mrb[105].mxu1  ;;  %1718 = vmatmul.mubr.bf16.gmra.mrb[104].mxu0 %v1052_v45 }
 0x30d   :  { %v986_v51 = vpop.f32.mrb[106].mxu1  ;;  %1721 = vmatprep.mubr.msk.bf16.mxu0 %vm1753_vm1, %v1752_v0 }
 0x30e   :  { %v987_v19 = vadd.f32 %v2730_v32, %v986_v51  ;;  %v1632_v57 = vpop.f32.mrb[107].mxu1  ;;  %v1032_v21 = vmax.f32 %v984_v16, 0.0 }
 0x310   :  { %v1033_v24 = vmax.f32 %v987_v19, 0.0 }
 0x312   :  { %v1053_v6 = vpack.c.bf16 %v1033_v24, %v1032_v21 }
 0x313   :  { %v991_v60 = vpop.f32.mrb[108].mxu1 }
 0x314   :  { %v992_v20 = vadd.f32 %v2730_v32, %v991_v60  ;;  %v1635_v25 = vpop.f32.mrb[109].mxu1  ;;  %1722 = vmatmul.mubr.bf16.gmra.mrb[108].mxu0 %v1053_v6 }
 0x315   :  { %v994_v23 = vpop.f32.mrb[110].mxu1  ;;  %1725 = vmatprep.mubr.msk.bf16.mxu0 %vm1753_vm1, %v1752_v0 }
 0x316   :  { %v995_v26 = vadd.f32 %v2730_v32, %v994_v23  ;;  %v1636_v28 = vpop.f32.mrb[111].mxu1  ;;  %v1034_v31 = vmax.f32 %v992_v20, 0.0 }
 0x318   :  { %v1035_v13 = vmax.f32 %v995_v26, 0.0 }
 0x31a   :  { %v1054_v35 = vpack.c.bf16 %v1035_v13, %v1034_v31 }
 0x31c   :  { %1726 = vmatmul.mubr.bf16.gmra.mrb[112].mxu0 %v1054_v35 }
 0x35f   :  { %v1160_v37 = vpop.f32.mrb[40].mxu0 }
 0x360   :  { %v1161_v30 = vadd.f32 %v2809_v27, %v1160_v37  ;;  %v1655_v9 = vpop.f32.mrb[41].mxu0 }
 0x361   :  { %v1163_v34 = vpop.f32.mrb[42].mxu0 }
 0x362   :  { %1311 = vst [vmem:[%s2972_s9] sm:$0xff] %v1161_v30  ;;  %v1164_v0 = vadd.f32 %v2809_v27, %v1163_v34  ;;  %v1656_v32 = vpop.f32.mrb[43].mxu0 }
 0x364   :  { %1312 = vst [vmem:[%s2972_s9 + $0x8] sm:$0xff] %v1164_v0 }
 0x367   :  { %v1168_v40 = vpop.f32.mrb[44].mxu0 }
 0x368   :  { %v1169_v2 = vadd.f32 %v2809_v27, %v1168_v40  ;;  %v1659_v55 = vpop.f32.mrb[45].mxu0 }
 0x369   :  { %v1171_v63 = vpop.f32.mrb[46].mxu0 }
 0x36a   :  { %1313 = vst [vmem:[%s2972_s9 + $0x10] sm:$0xff] %v1169_v2  ;;  %v1172_v47 = vadd.f32 %v2809_v27, %v1171_v63  ;;  %v1660_v33 = vpop.f32.mrb[47].mxu0 }
 0x36c   :  { %1314 = vst [vmem:[%s2972_s9 + $0x18] sm:$0xff] %v1172_v47 }
 0x36f   :  { %v1176_v36 = vpop.f32.mrb[48].mxu0 }
 0x370   :  { %v1177_v61 = vadd.f32 %v2809_v27, %v1176_v36  ;;  %v1663_v38 = vpop.f32.mrb[49].mxu0 }
 0x371   :  { %v1179_v43 = vpop.f32.mrb[50].mxu0 }
 0x372   :  { %1315 = vst [vmem:[%s2972_s9 + $0x20] sm:$0xff] %v1177_v61  ;;  %v1180_v54 = vadd.f32 %v2809_v27, %v1179_v43  ;;  %v1664_v29 = vpop.f32.mrb[51].mxu0 }
 0x374   :  { %1316 = vst [vmem:[%s2972_s9 + $0x28] sm:$0xff] %v1180_v54 }
 0x377   :  { %v1184_v3 = vpop.f32.mrb[52].mxu0 }
 0x378   :  { %v1185_v14 = vadd.f32 %v2809_v27, %v1184_v3  ;;  %v1667_v12 = vpop.f32.mrb[53].mxu0 }
 0x379   :  { %v1187_v41 = vpop.f32.mrb[54].mxu0 }
 0x37a   :  { %1317 = vst [vmem:[%s2972_s9 + $0x30] sm:$0xff] %v1185_v14  ;;  %v1188_v62 = vadd.f32 %v2809_v27, %v1187_v41  ;;  %v1668_v39 = vpop.f32.mrb[55].mxu0 }
 0x37c   :  { %1318 = vst [vmem:[%s2972_s9 + $0x38] sm:$0xff] %v1188_v62 }
 0x37f   :  { %v1192_v42 = vpop.f32.mrb[56].mxu0 }
 0x380   :  { %v1193_v10 = vadd.f32 %v2809_v27, %v1192_v42  ;;  %v1671_v48 = vpop.f32.mrb[57].mxu0 }
 0x381   :  { %v1195_v22 = vpop.f32.mrb[58].mxu0 }
 0x382   :  { %1319 = vst [vmem:[%s2972_s9 + $0x40] sm:$0xff] %v1193_v10  ;;  %v1196_v52 = vadd.f32 %v2809_v27, %v1195_v22  ;;  %v1672_v7 = vpop.f32.mrb[59].mxu0 }
 0x384   :  { %1320 = vst [vmem:[%s2972_s9 + $0x48] sm:$0xff] %v1196_v52 }
 0x387   :  { %v1200_v56 = vpop.f32.mrb[60].mxu0 }
 0x388   :  { %v1201_v5 = vadd.f32 %v2809_v27, %v1200_v56  ;;  %v1675_v44 = vpop.f32.mrb[61].mxu0 }
 0x389   :  { %v1203_v46 = vpop.f32.mrb[62].mxu0 }
 0x38a   :  { %1321 = vst [vmem:[%s2972_s9 + $0x50] sm:$0xff] %v1201_v5  ;;  %v1204_v58 = vadd.f32 %v2809_v27, %v1203_v46  ;;  %v1676_v49 = vpop.f32.mrb[63].mxu0 }
 0x38c   :  { %1322 = vst [vmem:[%s2972_s9 + $0x58] sm:$0xff] %v1204_v58 }
 0x38f   :  { %v1208_v50 = vpop.f32.mrb[64].mxu0 }
 0x390   :  { %v1209_v59 = vadd.f32 %v2809_v27, %v1208_v50  ;;  %v1679_v1 = vpop.f32.mrb[65].mxu0 }
 0x391   :  { %v1211_v8 = vpop.f32.mrb[66].mxu0 }
 0x392   :  { %1323 = vst [vmem:[%s2972_s9 + $0x60] sm:$0xff] %v1209_v59  ;;  %v1212_v53 = vadd.f32 %v2809_v27, %v1211_v8  ;;  %v1680_v17 = vpop.f32.mrb[67].mxu0 }
 0x394   :  { %1324 = vst [vmem:[%s2972_s9 + $0x68] sm:$0xff] %v1212_v53 }
 0x397   :  { %v1216_v18 = vpop.f32.mrb[68].mxu0 }
 0x398   :  { %v1217_v4 = vadd.f32 %v2809_v27, %v1216_v18  ;;  %v1683_v45 = vpop.f32.mrb[69].mxu0 }
 0x399   :  { %v1219_v11 = vpop.f32.mrb[70].mxu0 }
 0x39a   :  { %1325 = vst [vmem:[%s2972_s9 + $0x70] sm:$0xff] %v1217_v4  ;;  %v1220_v16 = vadd.f32 %v2809_v27, %v1219_v11  ;;  %v1684_v15 = vpop.f32.mrb[71].mxu0 }
 0x39c   :  { %1326 = vst [vmem:[%s2972_s9 + $0x78] sm:$0xff] %v1220_v16 }
 0x39f   :  { %v1224_v51 = vpop.f32.mrb[72].mxu0 }
 0x3a0   :  { %v1225_v19 = vadd.f32 %v2809_v27, %v1224_v51  ;;  %v1687_v57 = vpop.f32.mrb[73].mxu0 }
 0x3a1   :  { %v1227_v21 = vpop.f32.mrb[74].mxu0 }
 0x3a2   :  { %1327 = vst [vmem:[%s2972_s9 + $0x80] sm:$0xff] %v1225_v19  ;;  %v1228_v24 = vadd.f32 %v2809_v27, %v1227_v21  ;;  %v1688_v6 = vpop.f32.mrb[75].mxu0 }
 0x3a4   :  { %1328 = vst [vmem:[%s2972_s9 + $0x88] sm:$0xff] %v1228_v24 }
 0x3a7   :  { %v1232_v60 = vpop.f32.mrb[76].mxu0 }
 0x3a8   :  { %v1233_v20 = vadd.f32 %v2809_v27, %v1232_v60  ;;  %v1691_v25 = vpop.f32.mrb[77].mxu0 }
 0x3a9   :  { %v1235_v23 = vpop.f32.mrb[78].mxu0 }
 0x3aa   :  { %1329 = vst [vmem:[%s2972_s9 + $0x90] sm:$0xff] %v1233_v20  ;;  %v1236_v26 = vadd.f32 %v2809_v27, %v1235_v23  ;;  %v1692_v28 = vpop.f32.mrb[79].mxu0 }
 0x3ac   :  { %1330 = vst [vmem:[%s2972_s9 + $0x98] sm:$0xff] %v1236_v26 }
 0x3af   :  { %v1240_v31 = vpop.f32.mrb[80].mxu0 }
 0x3b0   :  { %v1241_v13 = vadd.f32 %v2809_v27, %v1240_v31  ;;  %v1695_v35 = vpop.f32.mrb[81].mxu0 }
 0x3b1   :  { %v1243_v37 = vpop.f32.mrb[82].mxu0 }
 0x3b2   :  { %1331 = vst [vmem:[%s2972_s9 + $0xa0] sm:$0xff] %v1241_v13  ;;  %v1244_v30 = vadd.f32 %v2809_v27, %v1243_v37  ;;  %v1696_v9 = vpop.f32.mrb[83].mxu0 }
 0x3b4   :  { %1332 = vst [vmem:[%s2972_s9 + $0xa8] sm:$0xff] %v1244_v30 }
 0x3b7   :  { %v1248_v34 = vpop.f32.mrb[84].mxu0 }
 0x3b8   :  { %v1249_v0 = vadd.f32 %v2809_v27, %v1248_v34  ;;  %v1699_v32 = vpop.f32.mrb[85].mxu0 }
 0x3b9   :  { %v1251_v40 = vpop.f32.mrb[86].mxu0 }
 0x3ba   :  { %1333 = vst [vmem:[%s2972_s9 + $0xb0] sm:$0xff] %v1249_v0  ;;  %v1252_v2 = vadd.f32 %v2809_v27, %v1251_v40  ;;  %v1700_v55 = vpop.f32.mrb[87].mxu0 }
 0x3bc   :  { %1334 = vst [vmem:[%s2972_s9 + $0xb8] sm:$0xff] %v1252_v2 }
 0x3bf   :  { %v1256_v63 = vpop.f32.mrb[88].mxu0 }
 0x3c0   :  { %v1257_v47 = vadd.f32 %v2809_v27, %v1256_v63  ;;  %v1703_v33 = vpop.f32.mrb[89].mxu0 }
 0x3c1   :  { %v1259_v36 = vpop.f32.mrb[90].mxu0 }
 0x3c2   :  { %1335 = vst [vmem:[%s2972_s9 + $0xc0] sm:$0xff] %v1257_v47  ;;  %v1260_v61 = vadd.f32 %v2809_v27, %v1259_v36  ;;  %v1704_v38 = vpop.f32.mrb[91].mxu0 }
 0x3c4   :  { %1336 = vst [vmem:[%s2972_s9 + $0xc8] sm:$0xff] %v1260_v61 }
 0x3c7   :  { %v1264_v43 = vpop.f32.mrb[92].mxu0 }
 0x3c8   :  { %v1265_v54 = vadd.f32 %v2809_v27, %v1264_v43  ;;  %v1707_v29 = vpop.f32.mrb[93].mxu0 }
 0x3c9   :  { %v1267_v3 = vpop.f32.mrb[94].mxu0 }
 0x3ca   :  { %1337 = vst [vmem:[%s2972_s9 + $0xd0] sm:$0xff] %v1265_v54  ;;  %v1268_v14 = vadd.f32 %v2809_v27, %v1267_v3  ;;  %v1708_v12 = vpop.f32.mrb[95].mxu0 }
 0x3cc   :  { %1338 = vst [vmem:[%s2972_s9 + $0xd8] sm:$0xff] %v1268_v14 }
 0x3cf   :  { %v1272_v41 = vpop.f32.mrb[96].mxu0 }
 0x3d0   :  { %v1273_v62 = vadd.f32 %v2809_v27, %v1272_v41  ;;  %v1711_v39 = vpop.f32.mrb[97].mxu0 }
 0x3d1   :  { %v1275_v42 = vpop.f32.mrb[98].mxu0 }
 0x3d2   :  { %1339 = vst [vmem:[%s2972_s9 + $0xe0] sm:$0xff] %v1273_v62  ;;  %v1276_v10 = vadd.f32 %v2809_v27, %v1275_v42  ;;  %v1712_v48 = vpop.f32.mrb[99].mxu0 }
 0x3d4   :  { %1340 = vst [vmem:[%s2972_s9 + $0xe8] sm:$0xff] %v1276_v10 }
 0x3d7   :  { %v1280_v22 = vpop.f32.mrb[100].mxu0 }
 0x3d8   :  { %v1281_v52 = vadd.f32 %v2809_v27, %v1280_v22  ;;  %v1715_v7 = vpop.f32.mrb[101].mxu0 }
 0x3d9   :  { %v1283_v56 = vpop.f32.mrb[102].mxu0 }
 0x3da   :  { %1341 = vst [vmem:[%s2972_s9 + $0xf0] sm:$0xff] %v1281_v52  ;;  %v1284_v5 = vadd.f32 %v2809_v27, %v1283_v56  ;;  %v1716_v44 = vpop.f32.mrb[103].mxu0 }
 0x3dc   :  { %1342 = vst [vmem:[%s2972_s9 + $0xf8] sm:$0xff] %v1284_v5 }
 0x3df   :  { %v1288_v46 = vpop.f32.mrb[104].mxu0 }
 0x3e0   :  { %v1289_v58 = vadd.f32 %v2809_v27, %v1288_v46  ;;  %v1719_v49 = vpop.f32.mrb[105].mxu0 }
 0x3e1   :  { %v1291_v50 = vpop.f32.mrb[106].mxu0 }
 0x3e2   :  { %1343 = vst [vmem:[%s2972_s9 + $0x100] sm:$0xff] %v1289_v58  ;;  %v1292_v59 = vadd.f32 %v2809_v27, %v1291_v50  ;;  %v1720_v1 = vpop.f32.mrb[107].mxu0 }
 0x3e4   :  { %1344 = vst [vmem:[%s2972_s9 + $0x108] sm:$0xff] %v1292_v59 }
 0x3e7   :  { %v1296_v8 = vpop.f32.mrb[108].mxu0 }
 0x3e8   :  { %v1297_v53 = vadd.f32 %v2809_v27, %v1296_v8  ;;  %v1723_v17 = vpop.f32.mrb[109].mxu0 }
 0x3e9   :  { %v1299_v18 = vpop.f32.mrb[110].mxu0 }
 0x3ea   :  { %1345 = vst [vmem:[%s2972_s9 + $0x110] sm:$0xff] %v1297_v53  ;;  %v1300_v4 = vadd.f32 %v2809_v27, %v1299_v18  ;;  %v1724_v45 = vpop.f32.mrb[111].mxu0 }
 0x3ec   :  { %1346 = vst [vmem:[%s2972_s9 + $0x118] sm:$0xff] %v1300_v4 }
 0x3ef   :  { %v1304_v11 = vpop.f32.mrb[112].mxu0 }
 0x3f0   :  { %v1305_v16 = vadd.f32 %v2809_v27, %v1304_v11  ;;  %v1727_v15 = vpop.f32.mrb[113].mxu0 }
 0x3f1   :  { %v1307_v51 = vpop.f32.mrb[114].mxu0 }
 0x3f2   :  { %1347 = vst [vmem:[%s2972_s9 + $0x120] sm:$0xff] %v1305_v16  ;;  %v1308_v19 = vadd.f32 %v2809_v27, %v1307_v51  ;;  %v1728_v57 = vpop.f32.mrb[115].mxu0 }
 0x3f4   :  { %1348 = vst [vmem:[%s2972_s9 + $0x128] sm:$0xff] %v1308_v19 }

</bundles_post_ra>
